<compile_context>
chip_gen: v7x
topology: tpu7x:2x2x1
jax: 0.10.0
libtpu: 0.0.40
codegen_flags: <defaults>
</compile_context>

<pallas_src>
import jax
import jax.numpy as jnp
from jax.experimental import pallas as pl
from jax.experimental.pallas import tpu as pltpu

IN_DIM = 778 * 3          # 2334
H1 = 256
H2 = 128
OUT_DIM = 63
OUT_PAD = 128             # lane-dense output; extra W3/b3 columns are zero
BN_EPS = 1e-5


def _mlp_kernel(x_ref, w1_ref, b1_ref, w2_ref, b2_ref, w3_ref, b3_ref, o_ref):
    # In-kernel bf16 cast of the activations (saves the separate HBM pad/cast
    # pass); all matmuls accumulate in f32 on the MXU.  Bias-add / ReLU stay in
    # f32 before packing back to bf16 (v5e has no bf16 VALU).
    x = x_ref[...].astype(jnp.bfloat16)

    # Stage 1: Linear (eval-mode BN folded into W/b) -> ReLU.
    h = jnp.dot(x, w1_ref[...], preferred_element_type=jnp.float32)
    h = jnp.maximum(h + b1_ref[...], 0.0).astype(jnp.bfloat16)
    # Dropout -> identity in eval mode.

    # Stage 2: Linear (BN folded) -> ReLU.
    h = jnp.dot(h, w2_ref[...], preferred_element_type=jnp.float32)
    h = jnp.maximum(h + b2_ref[...], 0.0).astype(jnp.bfloat16)

    # Stage 3: final Linear (zero-padded to 128 output lanes -> unmasked vst).
    h = jnp.dot(h, w3_ref[...], preferred_element_type=jnp.float32)
    o_ref[...] = (h + b3_ref[...]).astype(o_ref.dtype)


def _pick_block_b(B):
    """Batch tile: big enough to fill the MXU / amortize grid-step overhead,
    small enough that typical batches keep >=2 grid steps (v7x 2-TC sharding),
    and a latency path for tiny batches."""
    if B >= 1024:
        return 512
    if B >= 512:
        return 256
    if B >= 128:
        return 128
    return max(8, ((B + 15) // 16) * 16)   # small-batch latency path


def mesh2pose_forward(mesh_coords, params, *, block_b=None):
    """mesh_coords: (B, 778, 3) float32 -> (B, 21, 3) float32."""
    B = mesh_coords.shape[0]
    x = mesh_coords.reshape(B, IN_DIM).astype(jnp.float32)   # free reshape

    if block_b is None:
        block_b = _pick_block_b(B)
    num_b_tiles = pl.cdiv(B, block_b)

    (w1, b1, w2, b2, w3, b3) = params

    # x stream: batch-tiled, 3-deep buffering when the grid is deep enough.
    x_bufs = 3 if num_b_tiles >= 3 else 2
    x_spec = pl.BlockSpec((block_b, IN_DIM), lambda i: (i, 0),
                          pipeline_mode=pl.Buffered(buffer_count=x_bufs))
    # Weights/biases: constant block index -> fetched once, single-buffered.
    const = lambda shape: pl.BlockSpec(shape, lambda i: (0, 0),
                                       pipeline_mode=pl.Buffered(buffer_count=1))

    out = pl.pallas_call(
        _mlp_kernel,
        out_shape=jax.ShapeDtypeStruct((B, OUT_PAD), jnp.float32),
        grid=(num_b_tiles,),
        in_specs=[
            x_spec,
            const((IN_DIM, H1)), const((1, H1)),
            const((H1, H2)), const((1, H2)),
            const((H2, OUT_PAD)), const((1, OUT_PAD)),
        ],
        out_specs=pl.BlockSpec((block_b, OUT_PAD), lambda i: (i, 0)),
        compiler_params=pltpu.CompilerParams(
            dimension_semantics=("parallel",),     # megacore sharding on v7x
            vmem_limit_bytes=32 << 20,             # <=~17 MiB footprint @512 rows
        ),
    )(x, w1, b1, w2, b2, w3, b3)

    # Rows past B (partial last tile) are never written; just drop pad columns.
    return out[:, :OUT_DIM].reshape(B, -1, 3)


def init_params(key, std=1e-4):
    """Mirror the PyTorch module's init_weights() (normal std=1e-4, bias=0),
    with eval-mode BN folded into the Linear weights/biases, lane padding on
    the last layer, and bf16 weights."""
    k1, k2, k3 = jax.random.split(key, 3)

    def linear(k, fan_in, fan_out):
        # torch Linear weight is (out, in); normal_init(std), bias=0.
        w_t = std * jax.random.normal(k, (fan_out, fan_in), dtype=jnp.float32)
        return jnp.transpose(w_t), jnp.zeros((fan_out,), jnp.float32)

    def fold_bn(w, b, num_features):
        gamma = jnp.ones((num_features,), jnp.float32)
        beta = jnp.zeros((num_features,), jnp.float32)
        running_mean = jnp.zeros((num_features,), jnp.float32)
        running_var = jnp.ones((num_features,), jnp.float32)
        scale = gamma / jnp.sqrt(running_var + BN_EPS)
        shift = beta - running_mean * scale
        return w * scale[None, :], b * scale + shift

    w1, b1 = fold_bn(*linear(k1, IN_DIM, H1), H1)
    w2, b2 = fold_bn(*linear(k2, H1, H2), H2)
    w3, b3 = linear(k3, H2, OUT_DIM)

    # Zero-pad only the final layer's output lanes (63 -> 128).
    w3 = jnp.pad(w3, ((0, 0), (0, OUT_PAD - OUT_DIM)))
    b3 = jnp.pad(b3, (0, OUT_PAD - OUT_DIM))

    return (w1.astype(jnp.bfloat16), b1.reshape(1, -1),
            w2.astype(jnp.bfloat16), b2.reshape(1, -1),
            w3.astype(jnp.bfloat16), b3.reshape(1, -1))


def _reference(mesh, prm):
    """Pure-JAX reference of the same bf16-weight eval-mode math."""
    (w1, b1, w2, b2, w3, b3) = prm
    f32 = jnp.float32
    xb = mesh.reshape(mesh.shape[0], -1).astype(jnp.bfloat16).astype(f32)
    h = jnp.maximum(xb @ w1.astype(f32) + b1, 0.0)
    h = h.astype(jnp.bfloat16).astype(f32)
    h = jnp.maximum(h @ w2.astype(f32) + b2, 0.0)
    h = h.astype(jnp.bfloat16).astype(f32)
    o = h @ w3.astype(f32) + b3
    return o[:, :OUT_DIM].reshape(mesh.shape[0], -1, 3)


if __name__ == "__main__":
    key = jax.random.PRNGKey(0)
    pkey, xkey, x2key = jax.random.split(key, 3)

    # 1) Faithful module init (std=1e-4), tiny batch (small-batch latency path).
    params = init_params(pkey)
    B = 2
    mesh_coords = jax.random.normal(xkey, (B, 778, 3), dtype=jnp.float32)
    j3d = jax.block_until_ready(mesh2pose_forward(mesh_coords, params))
    assert j3d.shape == (B, 21, 3), j3d.shape
    assert j3d.dtype == jnp.float32
    ref = _reference(mesh_coords, params)
    assert jnp.allclose(j3d, ref, atol=1e-5, rtol=1e-2), \
        float(jnp.max(jnp.abs(j3d - ref)))

    # 2) Stronger numeric check: larger weights, batch that does not divide the
    #    tile (exercises the masked edge block across >1 grid steps).
    params_big = init_params(pkey, std=0.05)
    B2 = 200
    mesh2 = jax.random.normal(x2key, (B2, 778, 3), dtype=jnp.float32)
    j3d2 = jax.block_until_ready(mesh2pose_forward(mesh2, params_big))
    assert j3d2.shape == (B2, 21, 3), j3d2.shape
    ref2 = _reference(mesh2, params_big)
    assert jnp.allclose(j3d2, ref2, atol=5e-3, rtol=2e-2), \
        float(jnp.max(jnp.abs(j3d2 - ref2)))

    print("KERNEL_OK")
</pallas_src>

<mosaic_0001>
module attributes {stable_mosaic.version = 11 : i64} {
  func.func @_mlp_kernel(%arg0: i32, %arg1: memref<16x2334xf32, #tpu.memory_space<vmem>>, %arg2: memref<2334x256xbf16, #tpu.memory_space<vmem>>, %arg3: memref<1x256xf32, #tpu.memory_space<vmem>>, %arg4: memref<256x128xbf16, #tpu.memory_space<vmem>>, %arg5: memref<1x128xf32, #tpu.memory_space<vmem>>, %arg6: memref<128x128xbf16, #tpu.memory_space<vmem>>, %arg7: memref<1x128xf32, #tpu.memory_space<vmem>>, %arg8: memref<16x128xf32, #tpu.memory_space<vmem>>) attributes {dimension_semantics = [#tpu.dimension_semantics<parallel>], iteration_bounds = array<i64: 1>, scalar_prefetch = 0 : i64, scratch_operands = 0 : i64, tpu.core_type = #tpu.core_type<tc>, window_params = [{pipeline_mode = #tpu.pipeline_mode<double_buffered>, transform_indices = @transform_0, window_bounds = array<i64: 16, 2334>}, {pipeline_mode = #tpu.pipeline_mode<synchronous>, transform_indices = @transform_1, window_bounds = array<i64: 2334, 256>}, {pipeline_mode = #tpu.pipeline_mode<synchronous>, transform_indices = @transform_2, window_bounds = array<i64: 1, 256>}, {pipeline_mode = #tpu.pipeline_mode<synchronous>, transform_indices = @transform_3, window_bounds = array<i64: 256, 128>}, {pipeline_mode = #tpu.pipeline_mode<synchronous>, transform_indices = @transform_4, window_bounds = array<i64: 1, 128>}, {pipeline_mode = #tpu.pipeline_mode<synchronous>, transform_indices = @transform_5, window_bounds = array<i64: 128, 128>}, {pipeline_mode = #tpu.pipeline_mode<synchronous>, transform_indices = @transform_6, window_bounds = array<i64: 1, 128>}, {transform_indices = @transform_7, window_bounds = array<i64: 16, 128>}]} {
    %c0 = arith.constant 0 : index
    %c0_0 = arith.constant 0 : index
    %0 = vector.load %arg1[%c0, %c0_0] : memref<16x2334xf32, #tpu.memory_space<vmem>>, vector<16x2334xf32>
    %1 = arith.truncf %0 : vector<16x2334xf32> to vector<16x2334xbf16>
    %c0_1 = arith.constant 0 : index
    %c0_2 = arith.constant 0 : index
    %2 = vector.load %arg2[%c0_1, %c0_2] : memref<2334x256xbf16, #tpu.memory_space<vmem>>, vector<2334x256xbf16>
    %cst = arith.constant dense<0.000000e+00> : vector<16x256xf32>
    %3 = tpu.matmul %1, %2, %cst {dimension_numbers = #tpu.dot_dimension_numbers<[1], [0], [0], [1], [0, 0, 1, 1], [], []>} : vector<16x2334xbf16>, vector<2334x256xbf16>, vector<16x256xf32> -> vector<16x256xf32>
    %c0_3 = arith.constant 0 : index
    %c0_4 = arith.constant 0 : index
    %4 = vector.load %arg3[%c0_3, %c0_4] : memref<1x256xf32, #tpu.memory_space<vmem>>, vector<1x256xf32>
    %5 = vector.broadcast %4 : vector<1x256xf32> to vector<16x256xf32>
    %6 = arith.addf %3, %5 : vector<16x256xf32>
    %cst_5 = arith.constant 0.000000e+00 : f32
    %7 = vector.broadcast %cst_5 : f32 to vector<16x256xf32>
    %8 = arith.maximumf %6, %7 : vector<16x256xf32>
    %9 = arith.truncf %8 : vector<16x256xf32> to vector<16x256xbf16>
    %c0_6 = arith.constant 0 : index
    %c0_7 = arith.constant 0 : index
    %10 = vector.load %arg4[%c0_6, %c0_7] : memref<256x128xbf16, #tpu.memory_space<vmem>>, vector<256x128xbf16>
    %cst_8 = arith.constant dense<0.000000e+00> : vector<16x128xf32>
    %11 = tpu.matmul %9, %10, %cst_8 {dimension_numbers = #tpu.dot_dimension_numbers<[1], [0], [0], [1], [0, 0, 1, 1], [], []>} : vector<16x256xbf16>, vector<256x128xbf16>, vector<16x128xf32> -> vector<16x128xf32>
    %c0_9 = arith.constant 0 : index
    %c0_10 = arith.constant 0 : index
    %12 = vector.load %arg5[%c0_9, %c0_10] : memref<1x128xf32, #tpu.memory_space<vmem>>, vector<1x128xf32>
    %13 = vector.broadcast %12 : vector<1x128xf32> to vector<16x128xf32>
    %14 = arith.addf %11, %13 : vector<16x128xf32>
    %cst_11 = arith.constant 0.000000e+00 : f32
    %15 = vector.broadcast %cst_11 : f32 to vector<16x128xf32>
    %16 = arith.maximumf %14, %15 : vector<16x128xf32>
    %17 = arith.truncf %16 : vector<16x128xf32> to vector<16x128xbf16>
    %c0_12 = arith.constant 0 : index
    %c0_13 = arith.constant 0 : index
    %18 = vector.load %arg6[%c0_12, %c0_13] : memref<128x128xbf16, #tpu.memory_space<vmem>>, vector<128x128xbf16>
    %cst_14 = arith.constant dense<0.000000e+00> : vector<16x128xf32>
    %19 = tpu.matmul %17, %18, %cst_14 {dimension_numbers = #tpu.dot_dimension_numbers<[1], [0], [0], [1], [0, 0, 1, 1], [], []>} : vector<16x128xbf16>, vector<128x128xbf16>, vector<16x128xf32> -> vector<16x128xf32>
    %c0_15 = arith.constant 0 : index
    %c0_16 = arith.constant 0 : index
    %20 = vector.load %arg7[%c0_15, %c0_16] : memref<1x128xf32, #tpu.memory_space<vmem>>, vector<1x128xf32>
    %21 = vector.broadcast %20 : vector<1x128xf32> to vector<16x128xf32>
    %22 = arith.addf %19, %21 : vector<16x128xf32>
    %c0_17 = arith.constant 0 : index
    %c0_18 = arith.constant 0 : index
    %23 = vector.load %arg8[%c0_17, %c0_18] : memref<16x128xf32, #tpu.memory_space<vmem>>, vector<16x128xf32>
    tpu.vector_store %arg8[%c0_17, %c0_18], %22 {strides = array<i32>} : memref<16x128xf32, #tpu.memory_space<vmem>>, vector<16x128xf32>,
    return
  }
  func.func @transform_0(%arg0: i32) -> (i32, i32) {
    %c0_i32 = arith.constant 0 : i32
    %c0_i32_0 = arith.constant 0 : i32
    return %arg0, %c0_i32 : i32, i32
  }
  func.func @transform_1(%arg0: i32) -> (i32, i32) {
    %c0_i32 = arith.constant 0 : i32
    %c0_i32_0 = arith.constant 0 : i32
    %c0_i32_1 = arith.constant 0 : i32
    return %c0_i32, %c0_i32_0 : i32, i32
  }
  func.func @transform_2(%arg0: i32) -> (i32, i32) {
    %c0_i32 = arith.constant 0 : i32
    %c0_i32_0 = arith.constant 0 : i32
    %c0_i32_1 = arith.constant 0 : i32
    return %c0_i32, %c0_i32_0 : i32, i32
  }
  func.func @transform_3(%arg0: i32) -> (i32, i32) {
    %c0_i32 = arith.constant 0 : i32
    %c0_i32_0 = arith.constant 0 : i32
    %c0_i32_1 = arith.constant 0 : i32
    return %c0_i32, %c0_i32_0 : i32, i32
  }
  func.func @transform_4(%arg0: i32) -> (i32, i32) {
    %c0_i32 = arith.constant 0 : i32
    %c0_i32_0 = arith.constant 0 : i32
    %c0_i32_1 = arith.constant 0 : i32
    return %c0_i32, %c0_i32_0 : i32, i32
  }
  func.func @transform_5(%arg0: i32) -> (i32, i32) {
    %c0_i32 = arith.constant 0 : i32
    %c0_i32_0 = arith.constant 0 : i32
    %c0_i32_1 = arith.constant 0 : i32
    return %c0_i32, %c0_i32_0 : i32, i32
  }
  func.func @transform_6(%arg0: i32) -> (i32, i32) {
    %c0_i32 = arith.constant 0 : i32
    %c0_i32_0 = arith.constant 0 : i32
    %c0_i32_1 = arith.constant 0 : i32
    return %c0_i32, %c0_i32_0 : i32, i32
  }
  func.func @transform_7(%arg0: i32) -> (i32, i32) {
    %c0_i32 = arith.constant 0 : i32
    %c0_i32_0 = arith.constant 0 : i32
    return %arg0, %c0_i32 : i32, i32
  }
}

</mosaic_0001>

<bundles_post_ra>
// kernel: tpu_custom_call.1
= control target key start
LH: loop header
LB: loop body
LE: loop exit
PB: predicated region body
PF: predicated region fallthrough
CT: control target
= control target key end

     0   :  { %12 = vsyncpa [#allocation3], 0  ;;  %s4615_s0 = inlined_call_operand.hbm [shape: f32[2,2334], index: 0, kind: input, shape index: {}]   ;;  %s4616_s1 = inlined_call_operand.hbm [shape: bf16[2334,256], index: 1, kind: input, shape index: {}]   ;;  %s4617_s2 = inlined_call_operand.hbm [shape: f32[1,256], index: 2, kind: input, shape index: {}]   ;;  %s4618_s3 = inlined_call_operand.hbm [shape: bf16[256,128], index: 3, kind: input, shape index: {}]   ;;  %s4619_s4 = inlined_call_operand.hbm [shape: f32[1,128], index: 4, kind: input, shape index: {}]   ;;  %s4620_s5 = inlined_call_operand.hbm [shape: bf16[128,128], index: 5, kind: input, shape index: {}]   ;;  %s4621_s6 = inlined_call_operand.hbm [shape: f32[1,128], index: 6, kind: input, shape index: {}]   ;;  %s4622_s7 = inlined_call_operand.hbm [shape: f32[2,128], index: 7, kind: output, shape index: {}]  }
   0x1   :  { %13 = vsyncpa [#allocation6], 0 }
   0x2   :  { %14 = vsyncpa [#allocation9], 0 }
   0x3   :  { %15 = vsyncpa [#allocation12], 0 }
   0x4   :  { %16 = vsyncpa [#allocation4], 0 }
   0x5   :  { %21 = vsyncadd [#allocation3], 4256  ;;  %s4273_s24 = smov [#allocation5]   ;;  %s4087_s28 = scalar_lea.hbm %s4616_s1, 37376 }
   0x6   :  { %s34_s25 = sshll.u32 %s4273_s24, 4  ;;  %p4088_p0 = scmp.ne.s32.totalorder %s4616_s1, %s4087_s28  ;;  %s35_s25 = int_to_ptr.vmem [resolvable:$true] %s34_s25 }
   0x7   :  { %p4091_p1 = scmp.lt.u32.totalorder %s4087_s28, %s4616_s1 }
   0x9   :  { %p4093_p2 = pnand %p4091_p1, %p4088_p0 }
   0xb   :  { %4096 = shalt.err (!%p4093_p2)
}
   0xc   :  { %s4097_s10 = scalar_lea.vmem %s35_s25, 37376  ;;  %p4102_p4 = scmp.lt.s32.totalorder %s35_s25, %s35_s25 }
   0xd   :  { %p4098_p3 = scmp.ne.s32.totalorder %s35_s25, %s4097_s10  ;;  %p4103_p5 = scmp.lt.s32.totalorder %s4097_s10, %s4097_s10 }
   0xf   :  { %p4104_p6 = por %p4103_p5, %p4102_p4 }
  0x11   :  { %p4105_p7 = pnand %p4104_p6, %p4098_p3 }
  0x13   :  { %4108 = shalt.err (!%p4105_p7)
}
  0x14   :  { %s4274_s11 = smov 128   ;;  %s4275_s12 = smov 8  }
  0x15   :  { %40 = dma.hbm_to_vmem [thread:$0]  %s4616_s1, 37376, %s35_s25, [#allocation6], %s4274_s11, %s4274_s11, %s4275_s12  }
  0x16   :  { %s4276_s15 = smov [#allocation8]   ;;  %s4109_s19 = scalar_lea.hbm %s4618_s3, 2048 }
  0x17   :  { %s56_s16 = sshll.u32 %s4276_s15, 4  ;;  %p4110_p8 = scmp.ne.s32.totalorder %s4618_s3, %s4109_s19  ;;  %s57_s16 = int_to_ptr.vmem [resolvable:$true] %s56_s16 }
  0x18   :  { %p4113_p9 = scmp.lt.u32.totalorder %s4109_s19, %s4618_s3 }
  0x1a   :  { %p4115_p10 = pnand %p4113_p9, %p4110_p8 }
  0x1c   :  { %4118 = shalt.err (!%p4115_p10)
}
  0x1d   :  { %s4119_s24 = scalar_lea.vmem %s57_s16, 2048  ;;  %p4124_p12 = scmp.lt.s32.totalorder %s57_s16, %s57_s16 }
  0x1e   :  { %p4120_p11 = scmp.ne.s32.totalorder %s57_s16, %s4119_s24  ;;  %p4125_p13 = scmp.lt.s32.totalorder %s4119_s24, %s4119_s24 }
  0x20   :  { %p4126_p0 = por %p4125_p13, %p4124_p12 }
  0x22   :  { %p4127_p1 = pnand %p4126_p0, %p4120_p11 }
  0x24   :  { %4130 = shalt.err (!%p4127_p1)
}
  0x25   :  { %s4277_s1 = smov 64   ;;  %s4278_s25 = smov 4  }
  0x26   :  { %62 = dma.hbm_to_vmem [thread:$0]  %s4618_s3, 2048, %s57_s16, [#allocation9], %s4277_s1, %s4277_s1, %s4278_s25  }
  0x27   :  { %s4279_s28 = smov [#allocation11]   ;;  %s4280_s30 = smov [#allocation2]  }
  0x28   :  { %s78_s29 = sshll.u32 %s4279_s28, 4  ;;  %s22_s8 = sshll.u32 %s4280_s30, 4  ;;  %s79_s29 = int_to_ptr.vmem [resolvable:$true] %s78_s29  ;;  %s4357_s8 = int_to_ptr.vmem [resolvable:$true] %s22_s8 }
  0x29   :  { %s4131_s11 = scalar_lea.hbm %s4620_s5, 1024 }
  0x2a   :  { %p4132_p2 = scmp.ne.s32.totalorder %s4620_s5, %s4131_s11  ;;  %p4135_p3 = scmp.lt.u32.totalorder %s4131_s11, %s4620_s5 }
  0x2c   :  { %p4137_p4 = pnand %p4135_p3, %p4132_p2 }
  0x2e   :  { %4140 = shalt.err (!%p4137_p4)
}
  0x2f   :  { %s4141_s3 = scalar_lea.vmem %s79_s29, 1024  ;;  %p4146_p6 = scmp.lt.s32.totalorder %s79_s29, %s79_s29 }
  0x30   :  { %p4142_p5 = scmp.ne.s32.totalorder %s79_s29, %s4141_s3  ;;  %p4147_p7 = scmp.lt.s32.totalorder %s4141_s3, %s4141_s3 }
  0x32   :  { %p4148_p8 = por %p4147_p7, %p4146_p6 }
  0x34   :  { %p4149_p9 = pnand %p4148_p8, %p4142_p5 }
  0x36   :  { %4152 = shalt.err (!%p4149_p9)
}
  0x37   :  { %84 = dma.hbm_to_vmem [thread:$0]  %s4620_s5, 1024, %s79_s29, [#allocation12], %s4277_s1, %s4277_s1, %s4278_s25  }
  0x38   :  { %s4153_s20 = scalar_lea.hbm %s4615_s0, 608 }
  0x39   :  { %p4154_p10 = scmp.ne.s32.totalorder %s4615_s0, %s4153_s20  ;;  %p4157_p11 = scmp.lt.u32.totalorder %s4153_s20, %s4615_s0 }
  0x3b   :  { %p4159_p12 = pnand %p4157_p11, %p4154_p10 }
  0x3d   :  { %4162 = shalt.err (!%p4159_p12)
}
  0x3e   :  { %s4163_s26 = scalar_lea.vmem %s4357_s8, 608  ;;  %s4167_s5 = scalar_lea.vmem %s4357_s8, 4864 }
  0x3f   :  { %p4164_p13 = scmp.ne.s32.totalorder %s4357_s8, %s4163_s26  ;;  %p4168_p0 = scmp.lt.s32.totalorder %s4357_s8, %s4357_s8 }
  0x40   :  { %p4169_p1 = scmp.lt.s32.totalorder %s4167_s5, %s4163_s26 }
  0x42   :  { %p4170_p2 = por %p4169_p1, %p4168_p0 }
  0x44   :  { %p4171_p3 = pnand %p4170_p2, %p4164_p13 }
  0x46   :  { %4174 = shalt.err (!%p4171_p3)
}
  0x47   :  { %s4281_s1 = smov 608   ;;  %s4282_s25 = smov 38  }
  0x48   :  { %28 = dma.hbm_to_vmem [thread:$0]  %s4615_s0, 608, %s4357_s8, [#allocation3], %s4281_s1, %s4281_s1, %s4282_s25  }
  0x49   :  { %s4283_s29 = smov [#allocation7]   ;;  %s4284_s9 = smov [#allocation10]  }
  0x4a   :  { %s47_s30 = sshll.u32 %s4283_s29, 4  ;;  %s69_s10 = sshll.u32 %s4284_s9, 4  ;;  %s48_s30 = int_to_ptr.vmem [resolvable:$true] %s47_s30  ;;  %s70_s10 = int_to_ptr.vmem [resolvable:$true] %s69_s10 }
  0x4b   :  { %s4175_s13 = scalar_lea.hbm %s4617_s2, 32 }
  0x4c   :  { %p4176_p4 = scmp.ne.s32.totalorder %s4617_s2, %s4175_s13  ;;  %p4179_p5 = scmp.lt.u32.totalorder %s4175_s13, %s4617_s2 }
  0x4e   :  { %p4181_p6 = pnand %p4179_p5, %p4176_p4 }
  0x50   :  { %4184 = shalt.err (!%p4181_p6)
}
  0x51   :  { %s4185_s0 = scalar_lea.vmem %s48_s30, 32  ;;  %p4190_p8 = scmp.lt.s32.totalorder %s48_s30, %s48_s30 }
  0x52   :  { %p4186_p7 = scmp.ne.s32.totalorder %s48_s30, %s4185_s0  ;;  %p4191_p9 = scmp.lt.s32.totalorder %s4185_s0, %s4185_s0 }
  0x54   :  { %p4192_p10 = por %p4191_p9, %p4190_p8 }
  0x56   :  { %p4193_p11 = pnand %p4192_p10, %p4186_p7 }
  0x58   :  { %4196 = shalt.err (!%p4193_p11)
}
  0x59   :  { %50 = dma.hbm_to_vmem [thread:$0]  %s4617_s2, 32, %s48_s30, [#allocation6]  }
  0x5a   :  { %s4197_s20 = scalar_lea.hbm %s4619_s4, 16 }
  0x5b   :  { %p4198_p12 = scmp.ne.s32.totalorder %s4619_s4, %s4197_s20  ;;  %p4201_p13 = scmp.lt.u32.totalorder %s4197_s20, %s4619_s4 }
  0x5d   :  { %p4203_p0 = pnand %p4201_p13, %p4198_p12 }
  0x5f   :  { %4206 = shalt.err (!%p4203_p0)
}
  0x60   :  { %s4207_s26 = scalar_lea.vmem %s70_s10, 16  ;;  %s4211_s5 = scalar_lea.vmem %s70_s10, 32 }
  0x61   :  { %p4208_p1 = scmp.ne.s32.totalorder %s70_s10, %s4207_s26  ;;  %p4212_p2 = scmp.lt.s32.totalorder %s70_s10, %s70_s10 }
  0x62   :  { %p4213_p3 = scmp.lt.s32.totalorder %s4211_s5, %s4207_s26 }
  0x64   :  { %p4214_p4 = por %p4213_p3, %p4212_p2 }
  0x66   :  { %p4215_p5 = pnand %p4214_p4, %p4208_p1 }
  0x68   :  { %4218 = shalt.err (!%p4215_p5)
}
  0x69   :  { %72 = dma.hbm_to_vmem [thread:$0]  %s4619_s4, 16, %s70_s10, [#allocation9]  }
  0x6a   :  { %s4285_s25 = smov [#allocation13]   ;;  %s4219_s30 = scalar_lea.hbm %s4621_s6, 16 }
  0x6b   :  { %s91_s27 = sshll.u32 %s4285_s25, 4  ;;  %p4220_p6 = scmp.ne.s32.totalorder %s4621_s6, %s4219_s30  ;;  %s92_s27 = int_to_ptr.vmem [resolvable:$true] %s91_s27 }
  0x6c   :  { %p4223_p7 = scmp.lt.u32.totalorder %s4219_s30, %s4621_s6 }
  0x6e   :  { %p4225_p8 = pnand %p4223_p7, %p4220_p6 }
  0x70   :  { %4228 = shalt.err (!%p4225_p8)
}
  0x71   :  { %s4229_s14 = scalar_lea.vmem %s92_s27, 16  ;;  %s4233_s4 = scalar_lea.vmem %s92_s27, 32 }
  0x72   :  { %p4230_p9 = scmp.ne.s32.totalorder %s92_s27, %s4229_s14  ;;  %p4234_p10 = scmp.lt.s32.totalorder %s92_s27, %s92_s27 }
  0x73   :  { %p4235_p11 = scmp.lt.s32.totalorder %s4233_s4, %s4229_s14 }
  0x75   :  { %p4236_p12 = por %p4235_p11, %p4234_p10 }
  0x77   :  { %p4237_p13 = pnand %p4236_p12, %p4230_p9 }
  0x79   :  { %4240 = shalt.err (!%p4237_p13)
}
  0x7a   :  { %94 = dma.hbm_to_vmem [thread:$0]  %s4621_s6, 16, %s92_s27, [#allocation12]  }
  0x7b   :  { %4263 = dma.done.wait [#allocation3], 4864  }
  0x7c   :  { %4264 = vsyncadd [#allocation3], 4294962432 }
  0x7d   :  { %4265 = dma.done.wait [#allocation6], 37408  }
  0x7e   :  { %4266 = vsyncadd [#allocation6], 4294929888 }
  0x7f   :  { %4267 = dma.done.wait [#allocation9], 2064  }
  0x80   :  { %4268 = vsyncadd [#allocation9], 4294965232 }
  0x81   :  { %4269 = dma.done.wait [#allocation12], 1040  }
  0x82   :  { %4270 = vsyncadd [#allocation12], 4294966256  ;;  %v3565_v0 = vld [vmem:[#allocation5 + $0x4] ss:$8 sps:$4 sm:$0xff]   ;;  %v3569_v2 = vld [vmem:[#allocation5] ss:$8 sps:$4 sm:$0xff]   ;;  %v204_v41 = vlaneseq }
  0x83   :  { %v3567_v1 = vld [vmem:[#allocation5 + $0x404] ss:$8 sps:$4 sm:$0xff]   ;;  %2385 = vmatprep.subr.bf16.mxu1 %v3565_v0  ;;  %v3570_v3 = vld [vmem:[#allocation5 + $0x400] ss:$8 sps:$4 sm:$0xff]   ;;  %v3571_v4 = vld [vmem:[#allocation5 + $0x14] ss:$8 sps:$4 sm:$0xff]  }
  0x84   :  { %2557 = vmatprep.subr.bf16.mxu0 %v3567_v1  ;;  %2386 = vmatpush1.bf16.msra.mxu1 %v3569_v2  ;;  %v3573_v5 = vld [vmem:[#allocation5 + $0x414] ss:$8 sps:$4 sm:$0xff]   ;;  %v3575_v6 = vld [vmem:[#allocation5 + $0x10] ss:$8 sps:$4 sm:$0xff]   ;;  %v3577_v8 = vld [vmem:[#allocation5 + $0x24] ss:$8 sps:$4 sm:$0xff]  }
  0x85   :  { %2558 = vmatpush1.bf16.msra.mxu0 %v3570_v3  ;;  %2387 = vmatprep.subr.bf16.mxu1 %v3571_v4  ;;  %v3576_v7 = vld [vmem:[#allocation5 + $0x410] ss:$8 sps:$4 sm:$0xff]   ;;  %v3579_v9 = vld [vmem:[#allocation5 + $0x424] ss:$8 sps:$4 sm:$0xff]   ;;  %v3581_v10 = vld [vmem:[#allocation5 + $0x20] ss:$8 sps:$4 sm:$0xff]  }
  0x86   :  { %2559 = vmatprep.subr.bf16.mxu0 %v3573_v5  ;;  %v3582_v11 = vld [vmem:[#allocation5 + $0x420] ss:$8 sps:$4 sm:$0xff]   ;;  %v3583_v12 = vld [vmem:[#allocation5 + $0x34] ss:$8 sps:$4 sm:$0xff]   ;;  %v3587_v14 = vld [vmem:[#allocation5 + $0x30] ss:$8 sps:$4 sm:$0xff]  }
  0x87   :  { %v3585_v13 = vld [vmem:[#allocation5 + $0x434] ss:$8 sps:$4 sm:$0xff]   ;;  %v3588_v15 = vld [vmem:[#allocation5 + $0x430] ss:$8 sps:$4 sm:$0xff]   ;;  %v3589_v16 = vld [vmem:[#allocation5 + $0x44] ss:$8 sps:$4 sm:$0xff]  }
  0x88   :  { %2388 = vmatpush1.bf16.msra.mxu1 %v3575_v6  ;;  %v3591_v17 = vld [vmem:[#allocation5 + $0x444] ss:$8 sps:$4 sm:$0xff]   ;;  %v3593_v18 = vld [vmem:[#allocation5 + $0x40] ss:$8 sps:$4 sm:$0xff]   ;;  %v3595_v20 = vld [vmem:[#allocation5 + $0x54] ss:$8 sps:$4 sm:$0xff]  }
  0x89   :  { %2560 = vmatpush1.bf16.msra.mxu0 %v3576_v7  ;;  %2389 = vmatprep.subr.bf16.mxu1 %v3577_v8  ;;  %v3594_v19 = vld [vmem:[#allocation5 + $0x440] ss:$8 sps:$4 sm:$0xff]   ;;  %v3597_v21 = vld [vmem:[#allocation5 + $0x454] ss:$8 sps:$4 sm:$0xff]   ;;  %v3599_v22 = vld [vmem:[#allocation5 + $0x50] ss:$8 sps:$4 sm:$0xff]  }
  0x8a   :  { %2561 = vmatprep.subr.bf16.mxu0 %v3579_v9  ;;  %v3600_v23 = vld [vmem:[#allocation5 + $0x450] ss:$8 sps:$4 sm:$0xff]   ;;  %v3601_v24 = vld [vmem:[#allocation5 + $0x64] ss:$8 sps:$4 sm:$0xff]   ;;  %v3605_v26 = vld [vmem:[#allocation5 + $0x60] ss:$8 sps:$4 sm:$0xff]  }
  0x8b   :  { %v3603_v25 = vld [vmem:[#allocation5 + $0x464] ss:$8 sps:$4 sm:$0xff]   ;;  %v3606_v27 = vld [vmem:[#allocation5 + $0x460] ss:$8 sps:$4 sm:$0xff]   ;;  %v3607_v28 = vld [vmem:[#allocation5 + $0x74] ss:$8 sps:$4 sm:$0xff]  }
  0x8c   :  { %2390 = vmatpush1.bf16.msra.mxu1 %v3581_v10  ;;  %v3609_v29 = vld [vmem:[#allocation5 + $0x474] ss:$8 sps:$4 sm:$0xff]   ;;  %v3611_v30 = vld [vmem:[#allocation5 + $0x70] ss:$8 sps:$4 sm:$0xff]   ;;  %v3613_v32 = vld [vmem:[#allocation5 + $0x84] ss:$8 sps:$4 sm:$0xff]  }
  0x8d   :  { %2562 = vmatpush1.bf16.msra.mxu0 %v3582_v11  ;;  %2391 = vmatprep.subr.bf16.mxu1 %v3583_v12  ;;  %v3612_v31 = vld [vmem:[#allocation5 + $0x470] ss:$8 sps:$4 sm:$0xff]   ;;  %v3615_v33 = vld [vmem:[#allocation5 + $0x484] ss:$8 sps:$4 sm:$0xff]   ;;  %v3617_v34 = vld [vmem:[#allocation5 + $0x80] ss:$8 sps:$4 sm:$0xff]  }
  0x8e   :  { %2563 = vmatprep.subr.bf16.mxu0 %v3585_v13  ;;  %v3618_v35 = vld [vmem:[#allocation5 + $0x480] ss:$8 sps:$4 sm:$0xff]   ;;  %v3619_v36 = vld [vmem:[#allocation5 + $0x94] ss:$8 sps:$4 sm:$0xff]   ;;  %v3623_v38 = vld [vmem:[#allocation5 + $0x90] ss:$8 sps:$4 sm:$0xff]  }
  0x8f   :  { %v3621_v37 = vld [vmem:[#allocation5 + $0x494] ss:$8 sps:$4 sm:$0xff]   ;;  %v4286_v39 = vmov 1983009808   ;;  %v3624_v42 = vld [vmem:[#allocation5 + $0x490] ss:$8 sps:$4 sm:$0xff]  }
  0x90   :  { %2392 = vmatpush1.bf16.msra.mxu1 %v3587_v14  ;;  %v202_v40 = vunpack.c.l.s4 %v4286_v39  ;;  %v3625_v43 = vld [vmem:[#allocation5 + $0xa4] ss:$8 sps:$4 sm:$0xff]   ;;  %v3629_v45 = vld [vmem:[#allocation5 + $0xa0] ss:$8 sps:$4 sm:$0xff]   ;;  %v4425_v48 = vshrl.u32 %v204_v41, 7  ;;  %vm2378_vm0 = vcmask 1046528  }
  0x91   :  { %2564 = vmatpush1.bf16.msra.mxu0 %v3588_v15  ;;  %2393 = vmatprep.subr.bf16.mxu1 %v3589_v16  ;;  %v3627_v44 = vld [vmem:[#allocation5 + $0x4a4] ss:$8 sps:$4 sm:$0xff]   ;;  %v3630_v46 = vld [vmem:[#allocation5 + $0x4a0] ss:$8 sps:$4 sm:$0xff]   ;;  %v3631_v49 = vld [vmem:[#allocation5 + $0xb4] ss:$8 sps:$4 sm:$0xff]  }
  0x92   :  { %2565 = vmatprep.subr.bf16.mxu0 %v3591_v17  ;;  %v203_v47 = vunpack.c.0.s8 %v202_v40  ;;  %v3633_v50 = vld [vmem:[#allocation5 + $0x4b4] ss:$8 sps:$4 sm:$0xff]   ;;  %v3635_v51 = vld [vmem:[#allocation5 + $0xb0] ss:$8 sps:$4 sm:$0xff]   ;;  %v3637_v53 = vld [vmem:[#allocation5 + $0xc4] ss:$8 sps:$4 sm:$0xff]  }
  0x93   :  { %v3636_v52 = vld [vmem:[#allocation5 + $0x4b0] ss:$8 sps:$4 sm:$0xff]   ;;  %v3639_v55 = vld [vmem:[#allocation5 + $0x4c4] ss:$8 sps:$4 sm:$0xff]   ;;  %v3641_v57 = vld [vmem:[#allocation5 + $0xc0] ss:$8 sps:$4 sm:$0xff]  }
  0x94   :  { %2394 = vmatpush1.bf16.msra.mxu1 %v3593_v18  ;;  %v4428_v54 = vsub.s32 %v203_v47, %v4425_v48  ;;  %v3661_v56 = vld [vmem:[#allocation2] ss:$38 sps:$4 sm:$0xff]   ;;  %v3664_v58 = vld [vmem:[#allocation2 + $0x4c] ss:$38 sps:$4 sm:$0xff]   ;;  %vm2374_vm1 = vcmask 244736   ;;  %vm4289_vm2 = vmmov 0  }
  0x95   :  { %2566 = vmatpush1.bf16.msra.mxu0 %v3594_v19  ;;  %2395 = vmatprep.subr.bf16.mxu1 %v3595_v20  ;;  %v3667_v59 = vld [vmem:[#allocation2 + $0x98] ss:$38 sps:$4 sm:$0xff]   ;;  %v3643_v61 = vld [vmem:[#allocation5 + $0xd4] ss:$8 sps:$4 sm:$0xff]  }
  0x96   :  { %2567 = vmatprep.subr.bf16.mxu0 %v3597_v21  ;;  %v3642_v60 = vld [vmem:[#allocation5 + $0x4c0] ss:$8 sps:$4 sm:$0xff]   ;;  %v4431_v62 = vrot.slane %v3661_v56, %v4428_v54  ;;  %v3670_v63 = vld [vmem:[#allocation2 + $0xe4] ss:$38 sps:$4 sm:$0xff]   ;;  %v4434_v1 = vrot.slane %v3664_v58, %v4428_v54  ;;  %v4437_v2 = vrot.slane %v3667_v59, %v4428_v54  ;;  %v3649_v9 = vld [vmem:[#allocation5 + $0xe4] ss:$8 sps:$4 sm:$0xff]  }
  0x97   :  { %v3645_v0 = vld [vmem:[#allocation5 + $0x4d4] ss:$8 sps:$4 sm:$0xff]   ;;  %v4440_v4 = vrot.slane %v3670_v63, %v4428_v54  ;;  %v3647_v5 = vld [vmem:[#allocation5 + $0xd0] ss:$8 sps:$4 sm:$0xff]   ;;  %v3666_v7 = vld [vmem:[#allocation2 + $0x50] ss:$38 sps:$4 sm:$0xff]  }
  0x98   :  { %2396 = vmatpush1.bf16.msra.mxu1 %v3599_v22  ;;  %v3663_v3 = vld [vmem:[#allocation2 + $0x4] ss:$38 sps:$4 sm:$0xff]   ;;  %v230_v8 = vcombine.high %v4431_v62, %v4434_v1  ;;  %v3651_v10 = vld [vmem:[#allocation5 + $0x4e4] ss:$8 sps:$4 sm:$0xff]   ;;  %v3673_v56 = vld [vmem:[#allocation5 + $0x100] ss:$8 sps:$4 sm:$0xff]  }
  0x99   :  { %2568 = vmatpush1.bf16.msra.mxu0 %v3600_v23  ;;  %2397 = vmatprep.subr.bf16.mxu1 %v3601_v24  ;;  %v3648_v6 = vld [vmem:[#allocation5 + $0x4d0] ss:$8 sps:$4 sm:$0xff]   ;;  %v409_v13 = vcombine.high %v4437_v2, %v4440_v4  ;;  %v3676_v14 = vld [vmem:[#allocation2 + $0x10] ss:$38 sps:$4 sm:$0xff]  }
  0x9a   :  { %2569 = vmatprep.subr.bf16.mxu0 %v3603_v25  ;;  %v3669_v11 = vld [vmem:[#allocation2 + $0x9c] ss:$38 sps:$4 sm:$0xff]   ;;  %v3672_v12 = vld [vmem:[#allocation2 + $0xe8] ss:$38 sps:$4 sm:$0xff]   ;;  %v279_v21 = vrot.slane %v3676_v14, %v4428_v54 }
  0x9b   :  { %v3678_v15 = vld [vmem:[#allocation2 + $0x14] ss:$38 sps:$4 sm:$0xff]   ;;  %v594_v17 = vpack.c.bf16 %v409_v13, %v230_v8  ;;  %v3681_v18 = vld [vmem:[#allocation2 + $0x60] ss:$38 sps:$4 sm:$0xff]  }
  0x9c   :  { %2398 = vmatpush1.bf16.msra.mxu1 %v3605_v26  ;;  %v3679_v16 = vld [vmem:[#allocation2 + $0x5c] ss:$38 sps:$4 sm:$0xff]   ;;  %v3682_v19 = vld [vmem:[#allocation2 + $0xa8] ss:$38 sps:$4 sm:$0xff]  }
  0x9d   :  { %2570 = vmatpush1.bf16.msra.mxu0 %v3606_v27  ;;  %2399 = vmatprep.subr.bf16.mxu1 %v3607_v28  ;;  %v3684_v20 = vld [vmem:[#allocation2 + $0xac] ss:$38 sps:$4 sm:$0xff]   ;;  %v293_v22 = vrot.slane %v3679_v16, %v4428_v54  ;;  %v3687_v24 = vld [vmem:[#allocation2 + $0xf8] ss:$38 sps:$4 sm:$0xff]   ;;  %v458_v27 = vrot.slane %v3682_v19, %v4428_v54  ;;  %v4450_v28 = vrot.slane %v3663_v3, %v4428_v54 }
  0x9e   :  { %2571 = vmatprep.subr.bf16.mxu0 %v3609_v29  ;;  %v3685_v23 = vld [vmem:[#allocation2 + $0xf4] ss:$38 sps:$4 sm:$0xff]   ;;  %2417 = vmatprep.mubr.bf16.mxu1 %v594_v17  ;;  %v3655_v29 = vld [vmem:[#allocation5 + $0xf4] ss:$8 sps:$4 sm:$0xff]   ;;  %v4469_v39 = vrot.slane %v3684_v20, %v4428_v54  ;;  %v4472_v40 = vrot.slane %v3687_v24, %v4428_v54  ;;  %v3659_v41 = vld [vmem:[#allocation5 + $0xf0] ss:$8 sps:$4 sm:$0xff]  }
  0x9f   :  { %v3653_v25 = vld [vmem:[#allocation5 + $0xe0] ss:$8 sps:$4 sm:$0xff]   ;;  %v3675_v47 = vld [vmem:[#allocation5 + $0x104] ss:$8 sps:$4 sm:$0xff]   ;;  %v3703_v8 = vld [vmem:[#allocation5 + $0x130] ss:$8 sps:$4 sm:$0xff]  }
  0xa0   :  { %2400 = vmatpush1.bf16.msra.mxu1 %v3611_v30  ;;  %v3654_v26 = vld [vmem:[#allocation5 + $0x4e0] ss:$8 sps:$4 sm:$0xff]   ;;  %v302_v30 = vcombine.high %v279_v21, %v293_v22  ;;  %v3702_v3 = vld [vmem:[#allocation5 + $0x524] ss:$8 sps:$4 sm:$0xff]   ;;  %v3717_v14 = vld [vmem:[#allocation5 + $0x154] ss:$8 sps:$4 sm:$0xff]  }
  0xa1   :  { %2572 = vmatpush1.bf16.msra.mxu0 %v3612_v31  ;;  %2401 = vmatprep.subr.bf16.mxu1 %v3613_v32  ;;  %v472_v31 = vrot.slane %v3685_v23, %v4428_v54  ;;  %v4454_v32 = vrot.slane %v3666_v7, %v4428_v54  ;;  %v3708_v7 = vld [vmem:[#allocation5 + $0x534] ss:$8 sps:$4 sm:$0xff]   ;;  %v3712_v13 = vld [vmem:[#allocation5 + $0x540] ss:$8 sps:$4 sm:$0xff]   ;;  %v3715_v16 = vld [vmem:[#allocation5 + $0x150] ss:$8 sps:$4 sm:$0xff]  }
  0xa2   :  { %2573 = vmatprep.subr.bf16.mxu0 %v3615_v33  ;;  %v3657_v33 = vld [vmem:[#allocation5 + $0x4f4] ss:$8 sps:$4 sm:$0xff]   ;;  %v3718_v17 = vld [vmem:[#allocation5 + $0x550] ss:$8 sps:$4 sm:$0xff]   ;;  %v3726_v19 = vld [vmem:[#allocation5 + $0x564] ss:$8 sps:$4 sm:$0xff]  }
  0xa3   :  { %v3721_v20 = vld [vmem:[#allocation5 + $0x160] ss:$8 sps:$4 sm:$0xff]   ;;  %v3732_v23 = vld [vmem:[#allocation5 + $0x574] ss:$8 sps:$4 sm:$0xff]   ;;  %v3727_v24 = vld [vmem:[#allocation5 + $0x170] ss:$8 sps:$4 sm:$0xff]  }
  0xa4   :  { %2402 = vmatpush1.bf16.msra.mxu1 %v3617_v34  ;;  %v4457_v34 = vrot.slane %v3669_v11, %v4428_v54  ;;  %v3714_v11 = vld [vmem:[#allocation5 + $0x544] ss:$8 sps:$4 sm:$0xff]  }
  0xa5   :  { %2574 = vmatpush1.bf16.msra.mxu0 %v3618_v35  ;;  %2403 = vmatprep.subr.bf16.mxu1 %v3619_v36  ;;  %v4460_v35 = vrot.slane %v3672_v12, %v4428_v54  ;;  %v4463_v36 = vrot.slane %v3678_v15, %v4428_v54  ;;  %v3709_v12 = vld [vmem:[#allocation5 + $0x140] ss:$8 sps:$4 sm:$0xff]   ;;  %v3720_v15 = vld [vmem:[#allocation5 + $0x554] ss:$8 sps:$4 sm:$0xff]  }
  0xa6   :  { %2575 = vmatprep.subr.bf16.mxu0 %v3621_v37  ;;  %v481_v37 = vcombine.high %v458_v27, %v472_v31 }
  0xa8   :  { %2404 = vmatpush1.bf16.msra.mxu1 %v3623_v38  ;;  %v4466_v38 = vrot.slane %v3681_v18, %v4428_v54  ;;  %v3723_v18 = vld [vmem:[#allocation5 + $0x164] ss:$8 sps:$4 sm:$0xff]  }
  0xa9   :  { %2576 = vmatpush1.bf16.msra.mxu0 %v3624_v42  ;;  %2405 = vmatprep.subr.bf16.mxu1 %v3625_v43  ;;  %v3660_v42 = vld [vmem:[#allocation5 + $0x4f0] ss:$8 sps:$4 sm:$0xff]   ;;  %v229_v43 = vcombine.low %v4431_v62, %v4434_v1 }
  0xaa   :  { %2577 = vmatprep.subr.bf16.mxu0 %v3627_v44  ;;  %v408_v44 = vcombine.low %v4437_v2, %v4440_v4  ;;  %v3694_v1 = vld [vmem:[#allocation5 + $0x510] ss:$8 sps:$4 sm:$0xff]   ;;  %v3699_v2 = vld [vmem:[#allocation5 + $0x124] ss:$8 sps:$4 sm:$0xff]   ;;  %v3697_v4 = vld [vmem:[#allocation5 + $0x120] ss:$8 sps:$4 sm:$0xff]  }
  0xac   :  { %2406 = vmatpush1.bf16.msra.mxu1 %v3629_v45  ;;  %v301_v45 = vcombine.low %v279_v21, %v293_v22  ;;  %v593_v58 = vpack.c.bf16 %v408_v44, %v229_v43  ;;  %v3724_v21 = vld [vmem:[#allocation5 + $0x560] ss:$8 sps:$4 sm:$0xff]   ;;  %v3729_v22 = vld [vmem:[#allocation5 + $0x174] ss:$8 sps:$4 sm:$0xff]   ;;  %v3750_v43 = vld [vmem:[#allocation5 + $0x5a4] ss:$8 sps:$4 sm:$0xff]  }
  0xad   :  { %2578 = vmatpush1.bf16.msra.mxu0 %v3630_v46  ;;  %2407 = vmatprep.subr.bf16.mxu1 %v3631_v49  ;;  %v480_v46 = vcombine.low %v458_v27, %v472_v31  ;;  %v602_v49 = vpack.c.bf16 %v481_v37, %v302_v30  ;;  %v3738_v27 = vld [vmem:[#allocation5 + $0x584] ss:$8 sps:$4 sm:$0xff]   ;;  %v3736_v30 = vld [vmem:[#allocation5 + $0x580] ss:$8 sps:$4 sm:$0xff]   ;;  %v3741_v31 = vld [vmem:[#allocation5 + $0x194] ss:$8 sps:$4 sm:$0xff]  }
  0xae   :  { %2579 = vmatprep.subr.bf16.mxu0 %v3633_v50  ;;  %v3690_v50 = vld [vmem:[#allocation5 + $0x504] ss:$8 sps:$4 sm:$0xff]   ;;  %v3739_v37 = vld [vmem:[#allocation5 + $0x190] ss:$8 sps:$4 sm:$0xff]   ;;  %v3745_v44 = vld [vmem:[#allocation5 + $0x1a0] ss:$8 sps:$4 sm:$0xff]  }
  0xaf   :  { %2589 = vmatprep.mubr.bf16.mxu0 %v602_v49  ;;  %v601_v59 = vpack.c.bf16 %v480_v46, %v301_v45  ;;  %v3748_v45 = vld [vmem:[#allocation5 + $0x5a0] ss:$8 sps:$4 sm:$0xff]   ;;  %v3753_v46 = vld [vmem:[#allocation5 + $0x1b4] ss:$8 sps:$4 sm:$0xff]   ;;  %v3751_v49 = vld [vmem:[#allocation5 + $0x1b0] ss:$8 sps:$4 sm:$0xff]  }
  0xb0   :  { %2408 = vmatpush1.bf16.msra.mxu1 %v3635_v51  ;;  %v232_v51 = vcombine.high %v4450_v28, %v4454_v32 }
  0xb1   :  { %2580 = vmatpush1.bf16.msra.mxu0 %v3636_v52  ;;  %2409 = vmatprep.subr.bf16.mxu1 %v3637_v53  ;;  %v411_v52 = vcombine.high %v4457_v34, %v4460_v35  ;;  %v304_v53 = vcombine.high %v4463_v36, %v4466_v38 }
  0xb2   :  { %2581 = vmatprep.subr.bf16.mxu0 %v3639_v55  ;;  %v483_v55 = vcombine.high %v4469_v39, %v4472_v40 }
  0xb3   :  { %v596_v62 = vpack.c.bf16 %v411_v52, %v232_v51  ;;  %v3759_v51 = vld [vmem:[#allocation5 + $0x1c4] ss:$8 sps:$4 sm:$0xff]  }
  0xb4   :  { %2410 = vmatpush1.bf16.msra.mxu1 %v3641_v57  ;;  %v3688_v57 = vld [vmem:[#allocation5 + $0x500] ss:$8 sps:$4 sm:$0xff]   ;;  %v604_v63 = vpack.c.bf16 %v483_v55, %v304_v53  ;;  %v3762_v52 = vld [vmem:[#allocation5 + $0x5c4] ss:$8 sps:$4 sm:$0xff]  }
  0xb5   :  { %2582 = vmatpush1.bf16.msra.mxu0 %v3642_v60  ;;  %2411 = vmatprep.subr.bf16.mxu1 %v3643_v61  ;;  %v3693_v60 = vld [vmem:[#allocation5 + $0x114] ss:$8 sps:$4 sm:$0xff]   ;;  %v3757_v53 = vld [vmem:[#allocation5 + $0x1c0] ss:$8 sps:$4 sm:$0xff]  }
  0xb6   :  { %2583 = vmatprep.subr.bf16.mxu0 %v3645_v0  ;;  %v3696_v61 = vld [vmem:[#allocation5 + $0x514] ss:$8 sps:$4 sm:$0xff]   ;;  %v3691_v0 = vld [vmem:[#allocation5 + $0x110] ss:$8 sps:$4 sm:$0xff]   ;;  %v3760_v55 = vld [vmem:[#allocation5 + $0x5c0] ss:$8 sps:$4 sm:$0xff]  }
  0xb8   :  { %2412 = vmatpush1.bf16.msra.mxu1 %v3647_v5  ;;  %v3700_v5 = vld [vmem:[#allocation5 + $0x520] ss:$8 sps:$4 sm:$0xff]  }
  0xb9   :  { %2584 = vmatpush1.bf16.msra.mxu0 %v3648_v6  ;;  %2413 = vmatprep.subr.bf16.mxu1 %v3649_v9  ;;  %v3705_v6 = vld [vmem:[#allocation5 + $0x134] ss:$8 sps:$4 sm:$0xff]   ;;  %v3706_v9 = vld [vmem:[#allocation5 + $0x530] ss:$8 sps:$4 sm:$0xff]  }
  0xba   :  { %2585 = vmatprep.subr.bf16.mxu0 %v3651_v10  ;;  %v3711_v10 = vld [vmem:[#allocation5 + $0x144] ss:$8 sps:$4 sm:$0xff]  }
  0xbc   :  { %2414 = vmatpush1.bf16.msra.mxu1 %v3653_v25  ;;  %v3730_v25 = vld [vmem:[#allocation5 + $0x570] ss:$8 sps:$4 sm:$0xff]  }
  0xbd   :  { %2586 = vmatpush1.bf16.msra.mxu0 %v3654_v26  ;;  %2415 = vmatprep.subr.bf16.mxu1 %v3655_v29  ;;  %v3735_v26 = vld [vmem:[#allocation5 + $0x184] ss:$8 sps:$4 sm:$0xff]   ;;  %v3733_v29 = vld [vmem:[#allocation5 + $0x180] ss:$8 sps:$4 sm:$0xff]  }
  0xbe   :  { %2587 = vmatprep.subr.bf16.mxu0 %v3657_v33  ;;  %v3744_v33 = vld [vmem:[#allocation5 + $0x594] ss:$8 sps:$4 sm:$0xff]  }
  0xc0   :  { %2416 = vmatpush1.bf16.msra.mxu1 %v3659_v41  ;;  %v3742_v41 = vld [vmem:[#allocation5 + $0x590] ss:$8 sps:$4 sm:$0xff]  }
  0xc1   :  { %2588 = vmatpush1.bf16.msra.mxu0 %v3660_v42  ;;  %2428 = vmatprep.subr.bf16.mxu1 %v3675_v47  ;;  %v3747_v42 = vld [vmem:[#allocation5 + $0x1a4] ss:$8 sps:$4 sm:$0xff]   ;;  %v3756_v47 = vld [vmem:[#allocation5 + $0x5b4] ss:$8 sps:$4 sm:$0xff]  }
  0xc2   :  { %2600 = vmatprep.subr.bf16.mxu0 %v3690_v50  ;;  %v3754_v50 = vld [vmem:[#allocation5 + $0x5b0] ss:$8 sps:$4 sm:$0xff]  }
  0xc3   :  { %2418 = vmatmul.mubr.bf16.vlgmr.msra.gmra.mrb[0].mxu1 %v593_v58  ;;  %v3763_v58 = vld [vmem:[#allocation5 + $0x1d0] ss:$8 sps:$4 sm:$0xff]  }
  0xc4   :  { %2590 = vmatmul.mubr.bf16.vlgmr.msra.gmra.mrb[0].mxu0 %v601_v59  ;;  %2429 = vmatpush1.bf16.msra.mxu1 %v3673_v56  ;;  %v3765_v56 = vld [vmem:[#allocation5 + $0x1d4] ss:$8 sps:$4 sm:$0xff]   ;;  %v3766_v59 = vld [vmem:[#allocation5 + $0x5d0] ss:$8 sps:$4 sm:$0xff]  }
  0xc5   :  { %2601 = vmatpush1.bf16.msra.mxu0 %v3688_v57  ;;  %2430 = vmatprep.subr.bf16.mxu1 %v3693_v60  ;;  %v3768_v57 = vld [vmem:[#allocation5 + $0x5d4] ss:$8 sps:$4 sm:$0xff]   ;;  %v3771_v60 = vld [vmem:[#allocation5 + $0x1e4] ss:$8 sps:$4 sm:$0xff]  }
  0xc6   :  { %2602 = vmatprep.subr.bf16.mxu0 %v3696_v61  ;;  %2460 = vmatprep.mubr.bf16.mxu1 %v596_v62  ;;  %v3774_v61 = vld [vmem:[#allocation5 + $0x5e4] ss:$8 sps:$4 sm:$0xff]   ;;  %v3769_v62 = vld [vmem:[#allocation5 + $0x1e0] ss:$8 sps:$4 sm:$0xff]  }
  0xc7   :  { %2632 = vmatprep.mubr.bf16.mxu0 %v604_v63  ;;  %v3772_v63 = vld [vmem:[#allocation5 + $0x5e0] ss:$8 sps:$4 sm:$0xff]  }
  0xc8   :  { %2431 = vmatpush1.bf16.msra.mxu1 %v3691_v0  ;;  %v3777_v0 = vld [vmem:[#allocation5 + $0x1f4] ss:$8 sps:$4 sm:$0xff]  }
  0xc9   :  { %2603 = vmatpush1.bf16.msra.mxu0 %v3694_v1  ;;  %2432 = vmatprep.subr.bf16.mxu1 %v3699_v2  ;;  %v3780_v1 = vld [vmem:[#allocation5 + $0x5f4] ss:$8 sps:$4 sm:$0xff]   ;;  %v3775_v2 = vld [vmem:[#allocation5 + $0x1f0] ss:$8 sps:$4 sm:$0xff]  }
  0xca   :  { %2604 = vmatprep.subr.bf16.mxu0 %v3702_v3  ;;  %v3778_v3 = vld [vmem:[#allocation5 + $0x5f0] ss:$8 sps:$4 sm:$0xff]  }
  0xcc   :  { %2433 = vmatpush1.bf16.msra.mxu1 %v3697_v4  ;;  %v231_v4 = vcombine.low %v4450_v28, %v4454_v32  ;;  %v3789_v28 = vld [vmem:[#allocation5 + $0x214] ss:$8 sps:$4 sm:$0xff]  }
  0xcd   :  { %2605 = vmatpush1.bf16.msra.mxu0 %v3700_v5  ;;  %2434 = vmatprep.subr.bf16.mxu1 %v3705_v6  ;;  %v410_v5 = vcombine.low %v4457_v34, %v4460_v35  ;;  %v303_v6 = vcombine.low %v4463_v36, %v4466_v38  ;;  %v3792_v32 = vld [vmem:[#allocation5 + $0x614] ss:$8 sps:$4 sm:$0xff]   ;;  %v3787_v34 = vld [vmem:[#allocation5 + $0x210] ss:$8 sps:$4 sm:$0xff]   ;;  %v3795_v36 = vld [vmem:[#allocation5 + $0x224] ss:$8 sps:$4 sm:$0xff]  }
  0xce   :  { %2606 = vmatprep.subr.bf16.mxu0 %v3708_v7  ;;  %v482_v7 = vcombine.low %v4469_v39, %v4472_v40  ;;  %v3790_v35 = vld [vmem:[#allocation5 + $0x610] ss:$8 sps:$4 sm:$0xff]   ;;  %v3798_v38 = vld [vmem:[#allocation5 + $0x624] ss:$8 sps:$4 sm:$0xff]   ;;  %v3793_v39 = vld [vmem:[#allocation5 + $0x220] ss:$8 sps:$4 sm:$0xff]  }
  0xcf   :  { %v3796_v40 = vld [vmem:[#allocation5 + $0x620] ss:$8 sps:$4 sm:$0xff]  }
  0xd0   :  { %2435 = vmatpush1.bf16.msra.mxu1 %v3703_v8  ;;  %v3783_v8 = vld [vmem:[#allocation5 + $0x204] ss:$8 sps:$4 sm:$0xff]  }
  0xd1   :  { %2607 = vmatpush1.bf16.msra.mxu0 %v3706_v9  ;;  %2436 = vmatprep.subr.bf16.mxu1 %v3711_v10  ;;  %v3786_v9 = vld [vmem:[#allocation5 + $0x604] ss:$8 sps:$4 sm:$0xff]   ;;  %v3781_v10 = vld [vmem:[#allocation5 + $0x200] ss:$8 sps:$4 sm:$0xff]  }
  0xd2   :  { %2608 = vmatprep.subr.bf16.mxu0 %v3714_v11  ;;  %v3784_v11 = vld [vmem:[#allocation5 + $0x600] ss:$8 sps:$4 sm:$0xff]  }
  0xd4   :  { %2437 = vmatpush1.bf16.msra.mxu1 %v3709_v12  ;;  %v595_v12 = vpack.c.bf16 %v410_v5, %v231_v4  ;;  %v3829_v4 = vld [vmem:[#allocation5 + $0x280] ss:$8 sps:$4 sm:$0xff]  }
  0xd5   :  { %2609 = vmatpush1.bf16.msra.mxu0 %v3712_v13  ;;  %2438 = vmatprep.subr.bf16.mxu1 %v3717_v14  ;;  %v603_v13 = vpack.c.bf16 %v482_v7, %v303_v6  ;;  %v3801_v14 = vld [vmem:[#allocation5 + $0x234] ss:$8 sps:$4 sm:$0xff]   ;;  %v3832_v5 = vld [vmem:[#allocation5 + $0x680] ss:$8 sps:$4 sm:$0xff]  }
  0xd6   :  { %2610 = vmatprep.subr.bf16.mxu0 %v3720_v15  ;;  %v3804_v15 = vld [vmem:[#allocation5 + $0x634] ss:$8 sps:$4 sm:$0xff]  }
  0xd7   :  { %v3837_v6 = vld [vmem:[#allocation5 + $0x294] ss:$8 sps:$4 sm:$0xff]  }
  0xd8   :  { %2439 = vmatpush1.bf16.msra.mxu1 %v3715_v16  ;;  %v3799_v16 = vld [vmem:[#allocation5 + $0x230] ss:$8 sps:$4 sm:$0xff]   ;;  %v3840_v7 = vld [vmem:[#allocation5 + $0x694] ss:$8 sps:$4 sm:$0xff]  }
  0xd9   :  { %2611 = vmatpush1.bf16.msra.mxu0 %v3718_v17  ;;  %2440 = vmatprep.subr.bf16.mxu1 %v3723_v18  ;;  %v3802_v17 = vld [vmem:[#allocation5 + $0x630] ss:$8 sps:$4 sm:$0xff]   ;;  %v3807_v18 = vld [vmem:[#allocation5 + $0x244] ss:$8 sps:$4 sm:$0xff]  }
  0xda   :  { %2612 = vmatprep.subr.bf16.mxu0 %v3726_v19  ;;  %v3810_v19 = vld [vmem:[#allocation5 + $0x644] ss:$8 sps:$4 sm:$0xff]  }
  0xdc   :  { %2441 = vmatpush1.bf16.msra.mxu1 %v3721_v20  ;;  %v3877_v20 = vld [vmem:[#allocation2 + $0x8] ss:$38 sps:$4 sm:$0xff]  }
  0xdd   :  { %2613 = vmatpush1.bf16.msra.mxu0 %v3724_v21  ;;  %2442 = vmatprep.subr.bf16.mxu1 %v3729_v22  ;;  %v3879_v21 = vld [vmem:[#allocation2 + $0x54] ss:$38 sps:$4 sm:$0xff]  }
  0xde   :  { %2614 = vmatprep.subr.bf16.mxu0 %v3732_v23  ;;  %v3805_v22 = vld [vmem:[#allocation5 + $0x240] ss:$8 sps:$4 sm:$0xff]  }
  0xdf   :  { %v3808_v23 = vld [vmem:[#allocation5 + $0x640] ss:$8 sps:$4 sm:$0xff]  }
  0xe0   :  { %2443 = vmatpush1.bf16.msra.mxu1 %v3727_v24  ;;  %v3881_v24 = vld [vmem:[#allocation2 + $0xa0] ss:$38 sps:$4 sm:$0xff]  }
  0xe1   :  { %2615 = vmatpush1.bf16.msra.mxu0 %v3730_v25  ;;  %2444 = vmatprep.subr.bf16.mxu1 %v3735_v26  ;;  %v3883_v25 = vld [vmem:[#allocation2 + $0xec] ss:$38 sps:$4 sm:$0xff]  }
  0xe2   :  { %2616 = vmatprep.subr.bf16.mxu0 %v3738_v27  ;;  %v3813_v26 = vld [vmem:[#allocation5 + $0x254] ss:$8 sps:$4 sm:$0xff]  }
  0xe3   :  { %v3816_v27 = vld [vmem:[#allocation5 + $0x654] ss:$8 sps:$4 sm:$0xff]  }
  0xe4   :  { %2445 = vmatpush1.bf16.msra.mxu1 %v3733_v29  ;;  %v4495_v29 = vrot.slane %v3877_v20, %v4428_v54  ;;  %v3865_v20 = vld [vmem:[#allocation5 + $0x2e0] ss:$8 sps:$4 sm:$0xff]  }
  0xe5   :  { %2617 = vmatpush1.bf16.msra.mxu0 %v3736_v30  ;;  %2446 = vmatprep.subr.bf16.mxu1 %v3741_v31  ;;  %v4498_v30 = vrot.slane %v3879_v21, %v4428_v54  ;;  %v4501_v31 = vrot.slane %v3881_v24, %v4428_v54  ;;  %v3868_v21 = vld [vmem:[#allocation5 + $0x6e0] ss:$8 sps:$4 sm:$0xff]   ;;  %v3871_v24 = vld [vmem:[#allocation5 + $0x2f0] ss:$8 sps:$4 sm:$0xff]  }
  0xe6   :  { %2618 = vmatprep.subr.bf16.mxu0 %v3744_v33  ;;  %v4504_v33 = vrot.slane %v3883_v25, %v4428_v54  ;;  %v3874_v25 = vld [vmem:[#allocation5 + $0x6f0] ss:$8 sps:$4 sm:$0xff]  }
  0xe8   :  { %2447 = vmatpush1.bf16.msra.mxu1 %v3739_v37  ;;  %v266_v37 = vcombine.high %v4495_v29, %v4498_v30 }
  0xe9   :  { %2619 = vmatpush1.bf16.msra.mxu0 %v3742_v41  ;;  %2448 = vmatprep.subr.bf16.mxu1 %v3747_v42  ;;  %v3811_v41 = vld [vmem:[#allocation5 + $0x250] ss:$8 sps:$4 sm:$0xff]  }
  0xea   :  { %2620 = vmatprep.subr.bf16.mxu0 %v3750_v43  ;;  %v3814_v42 = vld [vmem:[#allocation5 + $0x650] ss:$8 sps:$4 sm:$0xff]   ;;  %v445_v43 = vcombine.high %v4501_v31, %v4504_v33 }
  0xec   :  { %2449 = vmatpush1.bf16.msra.mxu1 %v3745_v44  ;;  %v3888_v44 = vld [vmem:[#allocation2 + $0x18] ss:$38 sps:$4 sm:$0xff]  }
  0xed   :  { %2621 = vmatpush1.bf16.msra.mxu0 %v3748_v45  ;;  %2450 = vmatprep.subr.bf16.mxu1 %v3753_v46  ;;  %v3890_v45 = vld [vmem:[#allocation2 + $0x64] ss:$38 sps:$4 sm:$0xff]   ;;  %v3892_v46 = vld [vmem:[#allocation2 + $0xb0] ss:$38 sps:$4 sm:$0xff]  }
  0xee   :  { %2622 = vmatprep.subr.bf16.mxu0 %v3756_v47  ;;  %v3894_v47 = vld [vmem:[#allocation2 + $0xfc] ss:$38 sps:$4 sm:$0xff]  }
  0xf0   :  { %2451 = vmatpush1.bf16.msra.mxu1 %v3751_v49  ;;  %v3819_v49 = vld [vmem:[#allocation5 + $0x264] ss:$8 sps:$4 sm:$0xff]  }
  0xf1   :  { %2623 = vmatpush1.bf16.msra.mxu0 %v3754_v50  ;;  %2452 = vmatprep.subr.bf16.mxu1 %v3759_v51  ;;  %v598_v50 = vpack.c.bf16 %v445_v43, %v266_v37  ;;  %v4511_v51 = vrot.slane %v3888_v44, %v4428_v54  ;;  %v3898_v43 = vld [vmem:[#allocation5 + $0x704] ss:$8 sps:$4 sm:$0xff]  }
  0xf2   :  { %2624 = vmatprep.subr.bf16.mxu0 %v3762_v52  ;;  %v3822_v52 = vld [vmem:[#allocation5 + $0x664] ss:$8 sps:$4 sm:$0xff]  }
  0xf3   :  { %v3989_v44 = vld [vmem:[#allocation2 + $0xc] ss:$38 sps:$4 sm:$0xff]  }
  0xf4   :  { %2453 = vmatpush1.bf16.msra.mxu1 %v3757_v53  ;;  %v4514_v53 = vrot.slane %v3890_v45, %v4428_v54  ;;  %v3990_v45 = vld [vmem:[#allocation2 + $0x58] ss:$38 sps:$4 sm:$0xff]  }
  0xf5   :  { %2625 = vmatpush1.bf16.msra.mxu0 %v3760_v55  ;;  %2454 = vmatprep.subr.bf16.mxu1 %v3765_v56  ;;  %v4517_v55 = vrot.slane %v3892_v46, %v4428_v54  ;;  %v4520_v56 = vrot.slane %v3894_v47, %v4428_v54  ;;  %v3885_v46 = vld [vmem:[#allocation5 + $0x300] ss:$8 sps:$4 sm:$0xff]  }
  0xf6   :  { %2626 = vmatprep.subr.bf16.mxu0 %v3768_v57  ;;  %v3817_v57 = vld [vmem:[#allocation5 + $0x260] ss:$8 sps:$4 sm:$0xff]   ;;  %v337_v37 = vcombine.low %v4511_v51, %v4514_v53 }
  0xf7   :  { %v3896_v47 = vld [vmem:[#allocation5 + $0x700] ss:$8 sps:$4 sm:$0xff]  }
  0xf8   :  { %2455 = vmatpush1.bf16.msra.mxu1 %v3763_v58  ;;  %v3820_v58 = vld [vmem:[#allocation5 + $0x660] ss:$8 sps:$4 sm:$0xff]  }
  0xf9   :  { %2627 = vmatpush1.bf16.msra.mxu0 %v3766_v59  ;;  %2456 = vmatprep.subr.bf16.mxu1 %v3771_v60  ;;  %v338_v59 = vcombine.high %v4511_v51, %v4514_v53  ;;  %v517_v60 = vcombine.high %v4517_v55, %v4520_v56  ;;  %v4538_v51 = vrot.slane %v3990_v45, %v4428_v54  ;;  %v3995_v53 = vld [vmem:[#allocation2 + $0xb4] ss:$38 sps:$4 sm:$0xff]  }
  0xfa   :  { %2628 = vmatprep.subr.bf16.mxu0 %v3774_v61  ;;  %v3825_v61 = vld [vmem:[#allocation5 + $0x274] ss:$8 sps:$4 sm:$0xff]  }
  0xfc   :  { %2457 = vmatpush1.bf16.msra.mxu1 %v3769_v62  ;;  %v3828_v62 = vld [vmem:[#allocation5 + $0x674] ss:$8 sps:$4 sm:$0xff]  }
  0xfd   :  { %2629 = vmatpush1.bf16.msra.mxu0 %v3772_v63  ;;  %2458 = vmatprep.subr.bf16.mxu1 %v3777_v0  ;;  %v606_v63 = vpack.c.bf16 %v517_v60, %v338_v59  ;;  %v3823_v0 = vld [vmem:[#allocation5 + $0x270] ss:$8 sps:$4 sm:$0xff]   ;;  %v3904_v60 = vld [vmem:[#allocation5 + $0x714] ss:$8 sps:$4 sm:$0xff]  }
  0xfe   :  { %2630 = vmatprep.subr.bf16.mxu0 %v3780_v1  ;;  %v3826_v1 = vld [vmem:[#allocation5 + $0x670] ss:$8 sps:$4 sm:$0xff]  }
 0x100   :  { %2459 = vmatpush1.bf16.msra.mxu1 %v3775_v2  ;;  %v3831_v2 = vld [vmem:[#allocation5 + $0x284] ss:$8 sps:$4 sm:$0xff]  }
 0x101   :  { %2631 = vmatpush1.bf16.msra.mxu0 %v3778_v3  ;;  %2471 = vmatprep.subr.bf16.mxu1 %v3783_v8  ;;  %v3834_v3 = vld [vmem:[#allocation5 + $0x684] ss:$8 sps:$4 sm:$0xff]   ;;  %v3835_v8 = vld [vmem:[#allocation5 + $0x290] ss:$8 sps:$4 sm:$0xff]  }
 0x102   :  { %2643 = vmatprep.subr.bf16.mxu0 %v3786_v9  ;;  %v3838_v9 = vld [vmem:[#allocation5 + $0x690] ss:$8 sps:$4 sm:$0xff]  }
 0x103   :  { %2461 = vmatmul.mubr.bf16.vlgmr.msra.gmra.mrb[0].mxu1 %v595_v12  ;;  %v3841_v12 = vld [vmem:[#allocation5 + $0x2a0] ss:$8 sps:$4 sm:$0xff]  }
 0x104   :  { %2633 = vmatmul.mubr.bf16.vlgmr.msra.gmra.mrb[0].mxu0 %v603_v13  ;;  %2472 = vmatpush1.bf16.msra.mxu1 %v3781_v10  ;;  %v3843_v10 = vld [vmem:[#allocation5 + $0x2a4] ss:$8 sps:$4 sm:$0xff]   ;;  %v3844_v13 = vld [vmem:[#allocation5 + $0x6a0] ss:$8 sps:$4 sm:$0xff]  }
 0x105   :  { %2644 = vmatpush1.bf16.msra.mxu0 %v3784_v11  ;;  %2473 = vmatprep.subr.bf16.mxu1 %v3789_v28  ;;  %v3846_v11 = vld [vmem:[#allocation5 + $0x6a4] ss:$8 sps:$4 sm:$0xff]   ;;  %v3849_v28 = vld [vmem:[#allocation5 + $0x2b4] ss:$8 sps:$4 sm:$0xff]  }
 0x106   :  { %2645 = vmatprep.subr.bf16.mxu0 %v3792_v32  ;;  %2503 = vmatprep.mubr.bf16.mxu1 %v598_v50  ;;  %v3852_v32 = vld [vmem:[#allocation5 + $0x6b4] ss:$8 sps:$4 sm:$0xff]   ;;  %v4535_v50 = vrot.slane %v3989_v44, %v4428_v54  ;;  %v3946_v44 = vld [vmem:[#allocation5 + $0x784] ss:$8 sps:$4 sm:$0xff]  }
 0x107   :  { %2675 = vmatprep.mubr.bf16.mxu0 %v606_v63 }
 0x108   :  { %2474 = vmatpush1.bf16.msra.mxu1 %v3787_v34  ;;  %v3847_v34 = vld [vmem:[#allocation5 + $0x2b0] ss:$8 sps:$4 sm:$0xff]  }
 0x109   :  { %2646 = vmatpush1.bf16.msra.mxu0 %v3790_v35  ;;  %2475 = vmatprep.subr.bf16.mxu1 %v3795_v36  ;;  %v3850_v35 = vld [vmem:[#allocation5 + $0x6b0] ss:$8 sps:$4 sm:$0xff]   ;;  %v3855_v36 = vld [vmem:[#allocation5 + $0x2c4] ss:$8 sps:$4 sm:$0xff]  }
 0x10a   :  { %2647 = vmatprep.subr.bf16.mxu0 %v3798_v38  ;;  %v3858_v38 = vld [vmem:[#allocation5 + $0x6c4] ss:$8 sps:$4 sm:$0xff]  }
 0x10c   :  { %2476 = vmatpush1.bf16.msra.mxu1 %v3793_v39  ;;  %v3853_v39 = vld [vmem:[#allocation5 + $0x2c0] ss:$8 sps:$4 sm:$0xff]  }
 0x10d   :  { %2648 = vmatpush1.bf16.msra.mxu0 %v3796_v40  ;;  %2477 = vmatprep.subr.bf16.mxu1 %v3801_v14  ;;  %v3856_v40 = vld [vmem:[#allocation5 + $0x6c0] ss:$8 sps:$4 sm:$0xff]   ;;  %v3861_v14 = vld [vmem:[#allocation5 + $0x2d4] ss:$8 sps:$4 sm:$0xff]  }
 0x10e   :  { %2649 = vmatprep.subr.bf16.mxu0 %v3804_v15  ;;  %v3864_v15 = vld [vmem:[#allocation5 + $0x6d4] ss:$8 sps:$4 sm:$0xff]  }
 0x110   :  { %2478 = vmatpush1.bf16.msra.mxu1 %v3799_v16  ;;  %v3859_v16 = vld [vmem:[#allocation5 + $0x2d0] ss:$8 sps:$4 sm:$0xff]  }
 0x111   :  { %2650 = vmatpush1.bf16.msra.mxu0 %v3802_v17  ;;  %2479 = vmatprep.subr.bf16.mxu1 %v3807_v18  ;;  %v3862_v17 = vld [vmem:[#allocation5 + $0x6d0] ss:$8 sps:$4 sm:$0xff]   ;;  %v3867_v18 = vld [vmem:[#allocation5 + $0x2e4] ss:$8 sps:$4 sm:$0xff]  }
 0x112   :  { %2651 = vmatprep.subr.bf16.mxu0 %v3810_v19  ;;  %v3870_v19 = vld [vmem:[#allocation5 + $0x6e4] ss:$8 sps:$4 sm:$0xff]  }
 0x114   :  { %2480 = vmatpush1.bf16.msra.mxu1 %v3805_v22  ;;  %v3873_v22 = vld [vmem:[#allocation5 + $0x2f4] ss:$8 sps:$4 sm:$0xff]  }
 0x115   :  { %2652 = vmatpush1.bf16.msra.mxu0 %v3808_v23  ;;  %2481 = vmatprep.subr.bf16.mxu1 %v3813_v26  ;;  %v3876_v23 = vld [vmem:[#allocation5 + $0x6f4] ss:$8 sps:$4 sm:$0xff]   ;;  %v265_v26 = vcombine.low %v4495_v29, %v4498_v30  ;;  %v3992_v30 = vld [vmem:[#allocation2 + $0xf0] ss:$38 sps:$4 sm:$0xff]  }
 0x116   :  { %2653 = vmatprep.subr.bf16.mxu0 %v3816_v27  ;;  %v444_v27 = vcombine.low %v4501_v31, %v4504_v33  ;;  %v3991_v29 = vld [vmem:[#allocation2 + $0xa4] ss:$38 sps:$4 sm:$0xff]  }
 0x118   :  { %2482 = vmatpush1.bf16.msra.mxu1 %v3811_v41  ;;  %v516_v41 = vcombine.low %v4517_v55, %v4520_v56  ;;  %v597_v31 = vpack.c.bf16 %v444_v27, %v265_v26  ;;  %v3996_v55 = vld [vmem:[#allocation2 + $0x100] ss:$38 sps:$4 sm:$0xff]  }
 0x119   :  { %2654 = vmatpush1.bf16.msra.mxu0 %v3814_v42  ;;  %2483 = vmatprep.subr.bf16.mxu1 %v3819_v49  ;;  %v3887_v42 = vld [vmem:[#allocation5 + $0x304] ss:$8 sps:$4 sm:$0xff]   ;;  %v3901_v56 = vld [vmem:[#allocation5 + $0x314] ss:$8 sps:$4 sm:$0xff]  }
 0x11a   :  { %2655 = vmatprep.subr.bf16.mxu0 %v3822_v52  ;;  %v3993_v49 = vld [vmem:[#allocation2 + $0x1c] ss:$38 sps:$4 sm:$0xff]   ;;  %v605_v33 = vpack.c.bf16 %v516_v41, %v337_v37  ;;  %v3994_v52 = vld [vmem:[#allocation2 + $0x68] ss:$38 sps:$4 sm:$0xff]  }
 0x11b   :  { %v4547_v59 = vrot.slane %v3993_v49, %v4428_v54  ;;  %v4054_v27 = vld [vmem:[#allocation2 + $0x104] ss:$38 sps:$4 sm:$0xff]  }
 0x11c   :  { %2484 = vmatpush1.bf16.msra.mxu1 %v3817_v57  ;;  %v4541_v57 = vrot.slane %v3991_v29, %v4428_v54  ;;  %v3935_v37 = vld [vmem:[#allocation5 + $0x370] ss:$8 sps:$4 sm:$0xff]   ;;  %v4576_v45 = vrot.slane %v4054_v27, %v4428_v54  ;;  %v3952_v49 = vld [vmem:[#allocation5 + $0x794] ss:$8 sps:$4 sm:$0xff]   ;;  %v4015_v27 = vld [vmem:[#allocation5 + $0x860] ss:$8 sps:$4 sm:$0xff]  }
 0x11d   :  { %2656 = vmatpush1.bf16.msra.mxu0 %v3820_v58  ;;  %2485 = vmatprep.subr.bf16.mxu1 %v3825_v61  ;;  %v4544_v58 = vrot.slane %v3992_v30, %v4428_v54  ;;  %v268_v61 = vcombine.high %v4535_v50, %v4538_v51  ;;  %v3938_v41 = vld [vmem:[#allocation5 + $0x770] ss:$8 sps:$4 sm:$0xff]   ;;  %v3949_v30 = vld [vmem:[#allocation5 + $0x394] ss:$8 sps:$4 sm:$0xff]  }
 0x11e   :  { %2657 = vmatprep.subr.bf16.mxu0 %v3828_v62  ;;  %v4552_v62 = vrot.slane %v3994_v52, %v4428_v54  ;;  %v3947_v52 = vld [vmem:[#allocation5 + $0x390] ss:$8 sps:$4 sm:$0xff]  }
 0x11f   :  { %v447_v63 = vcombine.high %v4541_v57, %v4544_v58 }
 0x120   :  { %2486 = vmatpush1.bf16.msra.mxu1 %v3823_v0  ;;  %v4557_v0 = vrot.slane %v3995_v53, %v4428_v54  ;;  %v3950_v53 = vld [vmem:[#allocation5 + $0x790] ss:$8 sps:$4 sm:$0xff]  }
 0x121   :  { %2658 = vmatpush1.bf16.msra.mxu0 %v3826_v1  ;;  %2487 = vmatprep.subr.bf16.mxu1 %v3831_v2  ;;  %v4560_v1 = vrot.slane %v3996_v55, %v4428_v54  ;;  %v3899_v2 = vld [vmem:[#allocation5 + $0x310] ss:$8 sps:$4 sm:$0xff]   ;;  %v3955_v55 = vld [vmem:[#allocation5 + $0x3a4] ss:$8 sps:$4 sm:$0xff]  }
 0x122   :  { %2659 = vmatprep.subr.bf16.mxu0 %v3834_v3  ;;  %v3902_v3 = vld [vmem:[#allocation5 + $0x710] ss:$8 sps:$4 sm:$0xff]  }
 0x124   :  { %2488 = vmatpush1.bf16.msra.mxu1 %v3829_v4  ;;  %v340_v4 = vcombine.high %v4547_v59, %v4552_v62 }
 0x125   :  { %2660 = vmatpush1.bf16.msra.mxu0 %v3832_v5  ;;  %2489 = vmatprep.subr.bf16.mxu1 %v3837_v6  ;;  %v3907_v5 = vld [vmem:[#allocation5 + $0x324] ss:$8 sps:$4 sm:$0xff]   ;;  %v600_v6 = vpack.c.bf16 %v447_v63, %v268_v61  ;;  %v3956_v61 = vld [vmem:[#allocation5 + $0x7a0] ss:$8 sps:$4 sm:$0xff]   ;;  %v3961_v63 = vld [vmem:[#allocation5 + $0x3b4] ss:$8 sps:$4 sm:$0xff]  }
 0x126   :  { %2661 = vmatprep.subr.bf16.mxu0 %v3840_v7  ;;  %v519_v7 = vcombine.high %v4557_v0, %v4560_v1 }
 0x128   :  { %2490 = vmatpush1.bf16.msra.mxu1 %v3835_v8  ;;  %v3910_v8 = vld [vmem:[#allocation5 + $0x724] ss:$8 sps:$4 sm:$0xff]  }
 0x129   :  { %2662 = vmatpush1.bf16.msra.mxu0 %v3838_v9  ;;  %2491 = vmatprep.subr.bf16.mxu1 %v3843_v10  ;;  %v608_v9 = vpack.c.bf16 %v519_v7, %v340_v4  ;;  %v3905_v10 = vld [vmem:[#allocation5 + $0x320] ss:$8 sps:$4 sm:$0xff]   ;;  %v3962_v4 = vld [vmem:[#allocation5 + $0x7b0] ss:$8 sps:$4 sm:$0xff]  }
 0x12a   :  { %2663 = vmatprep.subr.bf16.mxu0 %v3846_v11  ;;  %v3908_v11 = vld [vmem:[#allocation5 + $0x720] ss:$8 sps:$4 sm:$0xff]  }
 0x12b   :  { %v3965_v7 = vld [vmem:[#allocation5 + $0x3c0] ss:$8 sps:$4 sm:$0xff]  }
 0x12c   :  { %2492 = vmatpush1.bf16.msra.mxu1 %v3841_v12  ;;  %v3913_v12 = vld [vmem:[#allocation5 + $0x334] ss:$8 sps:$4 sm:$0xff]  }
 0x12d   :  { %2664 = vmatpush1.bf16.msra.mxu0 %v3844_v13  ;;  %2493 = vmatprep.subr.bf16.mxu1 %v3849_v28  ;;  %v3916_v13 = vld [vmem:[#allocation5 + $0x734] ss:$8 sps:$4 sm:$0xff]   ;;  %v3911_v28 = vld [vmem:[#allocation5 + $0x330] ss:$8 sps:$4 sm:$0xff]  }
 0x12e   :  { %2665 = vmatprep.subr.bf16.mxu0 %v3852_v32  ;;  %v3914_v32 = vld [vmem:[#allocation5 + $0x730] ss:$8 sps:$4 sm:$0xff]  }
 0x130   :  { %2494 = vmatpush1.bf16.msra.mxu1 %v3847_v34  ;;  %v3919_v34 = vld [vmem:[#allocation5 + $0x344] ss:$8 sps:$4 sm:$0xff]  }
 0x131   :  { %2666 = vmatpush1.bf16.msra.mxu0 %v3850_v35  ;;  %2495 = vmatprep.subr.bf16.mxu1 %v3855_v36  ;;  %v3922_v35 = vld [vmem:[#allocation5 + $0x744] ss:$8 sps:$4 sm:$0xff]   ;;  %v3917_v36 = vld [vmem:[#allocation5 + $0x340] ss:$8 sps:$4 sm:$0xff]  }
 0x132   :  { %2667 = vmatprep.subr.bf16.mxu0 %v3858_v38  ;;  %v3920_v38 = vld [vmem:[#allocation5 + $0x740] ss:$8 sps:$4 sm:$0xff]  }
 0x134   :  { %2496 = vmatpush1.bf16.msra.mxu1 %v3853_v39  ;;  %v3925_v39 = vld [vmem:[#allocation5 + $0x354] ss:$8 sps:$4 sm:$0xff]  }
 0x135   :  { %2668 = vmatpush1.bf16.msra.mxu0 %v3856_v40  ;;  %2497 = vmatprep.subr.bf16.mxu1 %v3861_v14  ;;  %v3928_v40 = vld [vmem:[#allocation5 + $0x754] ss:$8 sps:$4 sm:$0xff]   ;;  %v3923_v14 = vld [vmem:[#allocation5 + $0x350] ss:$8 sps:$4 sm:$0xff]  }
 0x136   :  { %2669 = vmatprep.subr.bf16.mxu0 %v3864_v15  ;;  %v3926_v15 = vld [vmem:[#allocation5 + $0x750] ss:$8 sps:$4 sm:$0xff]  }
 0x138   :  { %2498 = vmatpush1.bf16.msra.mxu1 %v3859_v16  ;;  %v3931_v16 = vld [vmem:[#allocation5 + $0x364] ss:$8 sps:$4 sm:$0xff]  }
 0x139   :  { %2670 = vmatpush1.bf16.msra.mxu0 %v3862_v17  ;;  %2499 = vmatprep.subr.bf16.mxu1 %v3867_v18  ;;  %v3934_v17 = vld [vmem:[#allocation5 + $0x764] ss:$8 sps:$4 sm:$0xff]   ;;  %v3929_v18 = vld [vmem:[#allocation5 + $0x360] ss:$8 sps:$4 sm:$0xff]  }
 0x13a   :  { %2671 = vmatprep.subr.bf16.mxu0 %v3870_v19  ;;  %v3932_v19 = vld [vmem:[#allocation5 + $0x760] ss:$8 sps:$4 sm:$0xff]  }
 0x13c   :  { %2500 = vmatpush1.bf16.msra.mxu1 %v3865_v20  ;;  %v3937_v20 = vld [vmem:[#allocation5 + $0x374] ss:$8 sps:$4 sm:$0xff]  }
 0x13d   :  { %2672 = vmatpush1.bf16.msra.mxu0 %v3868_v21  ;;  %2501 = vmatprep.subr.bf16.mxu1 %v3873_v22  ;;  %v4045_v21 = vld [vmem:[#allocation2 + $0x20] ss:$38 sps:$4 sm:$0xff]  }
 0x13e   :  { %2673 = vmatprep.subr.bf16.mxu0 %v3876_v23  ;;  %v3940_v22 = vld [vmem:[#allocation5 + $0x774] ss:$8 sps:$4 sm:$0xff]  }
 0x13f   :  { %v4048_v23 = vld [vmem:[#allocation2 + $0x6c] ss:$38 sps:$4 sm:$0xff]  }
 0x140   :  { %2502 = vmatpush1.bf16.msra.mxu1 %v3871_v24  ;;  %v4567_v24 = vrot.slane %v4045_v21, %v4428_v54  ;;  %v4570_v26 = vrot.slane %v4048_v23, %v4428_v54  ;;  %v4006_v21 = vld [vmem:[#allocation5 + $0x830] ss:$8 sps:$4 sm:$0xff]   ;;  %v4009_v23 = vld [vmem:[#allocation5 + $0x840] ss:$8 sps:$4 sm:$0xff]  }
 0x141   :  { %2674 = vmatpush1.bf16.msra.mxu0 %v3874_v25  ;;  %2514 = vmatprep.subr.bf16.mxu1 %v3887_v42  ;;  %v4051_v25 = vld [vmem:[#allocation2 + $0xb8] ss:$38 sps:$4 sm:$0xff]  }
 0x142   :  { %2686 = vmatprep.subr.bf16.mxu0 %v3898_v43  ;;  %v4573_v42 = vrot.slane %v4051_v25, %v4428_v54  ;;  %v3943_v43 = vld [vmem:[#allocation5 + $0x384] ss:$8 sps:$4 sm:$0xff]   ;;  %v373_v29 = vcombine.low %v4567_v24, %v4570_v26  ;;  %v4012_v25 = vld [vmem:[#allocation5 + $0x850] ss:$8 sps:$4 sm:$0xff]  }
 0x143   :  { %2504 = vmatmul.mubr.bf16.vlgmr.msra.gmra.mrb[0].mxu1 %v597_v31 }
 0x144   :  { %2676 = vmatmul.mubr.bf16.vlgmr.msra.gmra.mrb[0].mxu0 %v605_v33  ;;  %2515 = vmatpush1.bf16.msra.mxu1 %v3885_v46  ;;  %v3941_v46 = vld [vmem:[#allocation5 + $0x380] ss:$8 sps:$4 sm:$0xff]   ;;  %v552_v31 = vcombine.low %v4573_v42, %v4576_v45 }
 0x145   :  { %2687 = vmatpush1.bf16.msra.mxu0 %v3896_v47  ;;  %2516 = vmatprep.subr.bf16.mxu1 %v3901_v56  ;;  %v3944_v47 = vld [vmem:[#allocation5 + $0x780] ss:$8 sps:$4 sm:$0xff]   ;;  %v3958_v56 = vld [vmem:[#allocation5 + $0x7a4] ss:$8 sps:$4 sm:$0xff]  }
 0x146   :  { %2688 = vmatprep.subr.bf16.mxu0 %v3904_v60  ;;  %2546 = vmatprep.mubr.bf16.mxu1 %v600_v6  ;;  %v4582_v33 = vpack.c.bf16 %v552_v31, %v373_v29  ;;  %v3953_v60 = vld [vmem:[#allocation5 + $0x3a0] ss:$8 sps:$4 sm:$0xff]   ;;  %v3970_v6 = vld [vmem:[#allocation5 + $0x7c4] ss:$8 sps:$4 sm:$0xff]   ;;  %v4032_v29 = vld [vmem:[#allocation5 + $0x8b4] ss:$8 sps:$4 sm:$0xff]  }
 0x147   :  { %2718 = vmatprep.mubr.bf16.mxu0 %v608_v9  ;;  %v3973_v9 = vld [vmem:[#allocation5 + $0x3d4] ss:$8 sps:$4 sm:$0xff]   ;;  %v4033_v31 = vld [vmem:[#allocation5 + $0x8c0] ss:$8 sps:$4 sm:$0xff]  }
 0x148   :  { %2517 = vmatpush1.bf16.msra.mxu1 %v3899_v2  ;;  %v3964_v2 = vld [vmem:[#allocation5 + $0x7b4] ss:$8 sps:$4 sm:$0xff]  }
 0x149   :  { %2689 = vmatpush1.bf16.msra.mxu0 %v3902_v3  ;;  %2518 = vmatprep.subr.bf16.mxu1 %v3907_v5  ;;  %v3959_v3 = vld [vmem:[#allocation5 + $0x3b0] ss:$8 sps:$4 sm:$0xff]   ;;  %v3967_v5 = vld [vmem:[#allocation5 + $0x3c4] ss:$8 sps:$4 sm:$0xff]  }
 0x14a   :  { %2690 = vmatprep.subr.bf16.mxu0 %v3910_v8  ;;  %v3968_v8 = vld [vmem:[#allocation5 + $0x7c0] ss:$8 sps:$4 sm:$0xff]  }
 0x14c   :  { %2519 = vmatpush1.bf16.msra.mxu1 %v3905_v10  ;;  %v3976_v10 = vld [vmem:[#allocation5 + $0x7d4] ss:$8 sps:$4 sm:$0xff]  }
 0x14d   :  { %2691 = vmatpush1.bf16.msra.mxu0 %v3908_v11  ;;  %2520 = vmatprep.subr.bf16.mxu1 %v3913_v12  ;;  %v3971_v11 = vld [vmem:[#allocation5 + $0x3d0] ss:$8 sps:$4 sm:$0xff]  }
 0x14e   :  { %2692 = vmatprep.subr.bf16.mxu0 %v3916_v13  ;;  %v3974_v12 = vld [vmem:[#allocation5 + $0x7d0] ss:$8 sps:$4 sm:$0xff]   ;;  %v3979_v13 = vld [vmem:[#allocation5 + $0x3e4] ss:$8 sps:$4 sm:$0xff]  }
 0x150   :  { %2521 = vmatpush1.bf16.msra.mxu1 %v3911_v28  ;;  %v3982_v28 = vld [vmem:[#allocation5 + $0x7e4] ss:$8 sps:$4 sm:$0xff]  }
 0x151   :  { %2693 = vmatpush1.bf16.msra.mxu0 %v3914_v32  ;;  %2522 = vmatprep.subr.bf16.mxu1 %v3919_v34  ;;  %v3977_v32 = vld [vmem:[#allocation5 + $0x3e0] ss:$8 sps:$4 sm:$0xff]  }
 0x152   :  { %2694 = vmatprep.subr.bf16.mxu0 %v3922_v35  ;;  %v3980_v34 = vld [vmem:[#allocation5 + $0x7e0] ss:$8 sps:$4 sm:$0xff]   ;;  %v3985_v35 = vld [vmem:[#allocation5 + $0x3f4] ss:$8 sps:$4 sm:$0xff]  }
 0x154   :  { %2523 = vmatpush1.bf16.msra.mxu1 %v3917_v36  ;;  %v3988_v36 = vld [vmem:[#allocation5 + $0x7f4] ss:$8 sps:$4 sm:$0xff]  }
 0x155   :  { %2695 = vmatpush1.bf16.msra.mxu0 %v3920_v38  ;;  %2524 = vmatprep.subr.bf16.mxu1 %v3925_v39  ;;  %v267_v38 = vcombine.low %v4535_v50, %v4538_v51  ;;  %v446_v39 = vcombine.low %v4541_v57, %v4544_v58  ;;  %v3999_v50 = vld [vmem:[#allocation5 + $0x804] ss:$8 sps:$4 sm:$0xff]   ;;  %v3997_v58 = vld [vmem:[#allocation5 + $0x800] ss:$8 sps:$4 sm:$0xff]  }
 0x156   :  { %2696 = vmatprep.subr.bf16.mxu0 %v3928_v40  ;;  %v339_v40 = vcombine.low %v4547_v59, %v4552_v62  ;;  %v4002_v62 = vld [vmem:[#allocation5 + $0x814] ss:$8 sps:$4 sm:$0xff]  }
 0x157   :  { %v599_v51 = vpack.c.bf16 %v446_v39, %v267_v38  ;;  %v4064_v38 = vld [vmem:[#allocation8] sm:$0xff]   ;;  %v4065_v39 = vld [vmem:[#allocation8 + $0x48] sm:$0xff]  }
 0x158   :  { %2525 = vmatpush1.bf16.msra.mxu1 %v3923_v14  ;;  %v518_v14 = vcombine.low %v4557_v0, %v4560_v1  ;;  %v4000_v0 = vld [vmem:[#allocation5 + $0x810] ss:$8 sps:$4 sm:$0xff]   ;;  %v4005_v1 = vld [vmem:[#allocation5 + $0x824] ss:$8 sps:$4 sm:$0xff]  }
 0x159   :  { %2697 = vmatpush1.bf16.msra.mxu0 %v3926_v15  ;;  %2526 = vmatprep.subr.bf16.mxu1 %v3931_v16  ;;  %v3983_v15 = vld [vmem:[#allocation5 + $0x3f0] ss:$8 sps:$4 sm:$0xff]  }
 0x15a   :  { %2698 = vmatprep.subr.bf16.mxu0 %v3934_v17  ;;  %v3986_v16 = vld [vmem:[#allocation5 + $0x7f0] ss:$8 sps:$4 sm:$0xff]   ;;  %v374_v17 = vcombine.high %v4567_v24, %v4570_v26  ;;  %v607_v57 = vpack.c.bf16 %v518_v14, %v339_v40  ;;  %v4014_v24 = vld [vmem:[#allocation5 + $0x854] ss:$8 sps:$4 sm:$0xff]   ;;  %v4017_v26 = vld [vmem:[#allocation5 + $0x864] ss:$8 sps:$4 sm:$0xff]  }
 0x15b   :  { %v4066_v40 = vld [vmem:[#allocation8 + $0x8] sm:$0xff]   ;;  %v4069_v14 = vld [vmem:[#allocation8 + $0x58] sm:$0xff]  }
 0x15c   :  { %2527 = vmatpush1.bf16.msra.mxu1 %v3929_v18  ;;  %v553_v18 = vcombine.high %v4573_v42, %v4576_v45  ;;  %v4023_v42 = vld [vmem:[#allocation5 + $0x884] ss:$8 sps:$4 sm:$0xff]   ;;  %v4024_v45 = vld [vmem:[#allocation5 + $0x890] ss:$8 sps:$4 sm:$0xff]  }
 0x15d   :  { %2699 = vmatpush1.bf16.msra.mxu0 %v3932_v19  ;;  %2528 = vmatprep.subr.bf16.mxu1 %v3937_v20  ;;  %v4003_v19 = vld [vmem:[#allocation5 + $0x820] ss:$8 sps:$4 sm:$0xff]   ;;  %v4008_v20 = vld [vmem:[#allocation5 + $0x834] ss:$8 sps:$4 sm:$0xff]  }
 0x15e   :  { %2700 = vmatprep.subr.bf16.mxu0 %v3940_v22  ;;  %v610_v59 = vpack.c.bf16 %v553_v18, %v374_v17  ;;  %v4011_v22 = vld [vmem:[#allocation5 + $0x844] ss:$8 sps:$4 sm:$0xff]  }
 0x15f   :  { %v4072_v17 = vld [vmem:[#allocation8 + $0x20] sm:$0xff]   ;;  %v4073_v18 = vld [vmem:[#allocation8 + $0x68] sm:$0xff]  }
 0x160   :  { %2529 = vmatpush1.bf16.msra.mxu1 %v3935_v37  ;;  %v4020_v37 = vld [vmem:[#allocation5 + $0x874] ss:$8 sps:$4 sm:$0xff]  }
 0x161   :  { %2701 = vmatpush1.bf16.msra.mxu0 %v3938_v41  ;;  %2530 = vmatprep.subr.bf16.mxu1 %v3943_v43  ;;  %v4018_v41 = vld [vmem:[#allocation5 + $0x870] ss:$8 sps:$4 sm:$0xff]   ;;  %v4021_v43 = vld [vmem:[#allocation5 + $0x880] ss:$8 sps:$4 sm:$0xff]  }
 0x162   :  { %2702 = vmatprep.subr.bf16.mxu0 %v3946_v44  ;;  %v4026_v44 = vld [vmem:[#allocation5 + $0x894] ss:$8 sps:$4 sm:$0xff]  }
 0x164   :  { %2531 = vmatpush1.bf16.msra.mxu1 %v3941_v46  ;;  %v4029_v46 = vld [vmem:[#allocation5 + $0x8a4] ss:$8 sps:$4 sm:$0xff]  }
 0x165   :  { %2703 = vmatpush1.bf16.msra.mxu0 %v3944_v47  ;;  %2532 = vmatprep.subr.bf16.mxu1 %v3949_v30  ;;  %v4027_v47 = vld [vmem:[#allocation5 + $0x8a0] ss:$8 sps:$4 sm:$0xff]   ;;  %v4030_v30 = vld [vmem:[#allocation5 + $0x8b0] ss:$8 sps:$4 sm:$0xff]  }
 0x166   :  { %2704 = vmatprep.subr.bf16.mxu0 %v3952_v49  ;;  %v4035_v49 = vld [vmem:[#allocation5 + $0x8c4] ss:$8 sps:$4 sm:$0xff]  }
 0x168   :  { %2533 = vmatpush1.bf16.msra.mxu1 %v3947_v52  ;;  %v4038_v52 = vld [vmem:[#allocation5 + $0x8d4] ss:$8 sps:$4 sm:$0xff]  }
 0x169   :  { %2705 = vmatpush1.bf16.msra.mxu0 %v3950_v53  ;;  %2534 = vmatprep.subr.bf16.mxu1 %v3955_v55  ;;  %v4036_v53 = vld [vmem:[#allocation5 + $0x8d0] ss:$8 sps:$4 sm:$0xff]   ;;  %v4041_v55 = vld [vmem:[#allocation5 + $0x8e4] ss:$8 sps:$4 sm:$0xff]  }
 0x16a   :  { %2706 = vmatprep.subr.bf16.mxu0 %v3958_v56  ;;  %v4039_v56 = vld [vmem:[#allocation5 + $0x8e0] ss:$8 sps:$4 sm:$0xff]  }
 0x16c   :  { %2535 = vmatpush1.bf16.msra.mxu1 %v3953_v60  ;;  %v4044_v60 = vld [vmem:[#allocation5 + $0x8f4] ss:$8 sps:$4 sm:$0xff]  }
 0x16d   :  { %2707 = vmatpush1.bf16.msra.mxu0 %v3956_v61  ;;  %2536 = vmatprep.subr.bf16.mxu1 %v3961_v63  ;;  %v4042_v61 = vld [vmem:[#allocation5 + $0x8f0] ss:$8 sps:$4 sm:$0xff]   ;;  %v4059_v63 = vld [vmem:[#allocation5 + $0x904] ss:$8 sps:$4 sm:$0xff]  }
 0x16e   :  { %2708 = vmatprep.subr.bf16.mxu0 %v3964_v2  ;;  %v4047_v2 = vld [vmem:[#allocation2 + $0x24] ss:$38 sps:$4 sm:$0x33]  }
 0x170   :  { %2537 = vmatpush1.bf16.msra.mxu1 %v3959_v3  ;;  %v4050_v3 = vld [vmem:[#allocation2 + $0x70] ss:$38 sps:$4 sm:$0x33]  }
 0x171   :  { %2709 = vmatpush1.bf16.msra.mxu0 %v3962_v4  ;;  %2538 = vmatprep.subr.bf16.mxu1 %v3967_v5  ;;  %v4053_v4 = vld [vmem:[#allocation2 + $0xbc] ss:$38 sps:$4 sm:$0x33]   ;;  %v4056_v5 = vld [vmem:[#allocation2 + $0x108] ss:$38 sps:$4 sm:$0x33]  }
 0x172   :  { %2710 = vmatprep.subr.bf16.mxu0 %v3970_v6  ;;  %v4057_v6 = vld [vmem:[#allocation5 + $0x900] ss:$8 sps:$4 sm:$0xff]  }
 0x174   :  { %2539 = vmatpush1.bf16.msra.mxu1 %v3965_v7  ;;  %v4060_v7 = vld [vmem:[#allocation5 + $0x914] ss:$8 sps:$4 sm:$0x7f]  }
 0x175   :  { %2711 = vmatpush1.bf16.msra.mxu0 %v3968_v8  ;;  %2540 = vmatprep.subr.bf16.mxu1 %v3973_v9  ;;  %v4062_v8 = vld [vmem:[#allocation5 + $0x910] ss:$8 sps:$4 sm:$0x7f]   ;;  %v358_v9 = vrot.slane %v4047_v2, %v4428_v54  ;;  %v4083_v2 = vld [vmem:[#allocation11 + $0x20] sm:$0xff]  }
 0x176   :  { %2712 = vmatprep.subr.bf16.mxu0 %v3976_v10  ;;  %v372_v10 = vrot.slane %v4050_v3, %v4428_v54  ;;  %v4084_v3 = vld [vmem:[#allocation11 + $0x28] sm:$0xff]  }
 0x178   :  { %2541 = vmatpush1.bf16.msra.mxu1 %v3971_v11  ;;  %v537_v11 = vrot.slane %v4053_v4, %v4428_v54  ;;  %v4085_v4 = vld [vmem:[#allocation11 + $0x30] sm:$0xff]  }
 0x179   :  { %2713 = vmatpush1.bf16.msra.mxu0 %v3974_v12  ;;  %2542 = vmatprep.subr.bf16.mxu1 %v3979_v13  ;;  %v551_v12 = vrot.slane %v4056_v5, %v4428_v54  ;;  %v4287_v13 = vmov 0   ;;  %v4067_v54 = vld [vmem:[#allocation8 + $0x50] sm:$0xff]   ;;  %v4086_v5 = vld [vmem:[#allocation11 + $0x38] sm:$0xff]  }
 0x17a   :  { %2714 = vmatprep.subr.bf16.mxu0 %v3982_v28  ;;  %v2380_v28 = vsel %vm2378_vm0, %v4062_v8, 0 }
 0x17c   :  { %2543 = vmatpush1.bf16.msra.mxu1 %v3977_v32  ;;  %v375_v32 = vcombine.low %v358_v9, %v372_v10 }
 0x17d   :  { %2715 = vmatpush1.bf16.msra.mxu0 %v3980_v34  ;;  %2544 = vmatprep.subr.bf16.mxu1 %v3985_v35  ;;  %v554_v34 = vcombine.low %v537_v11, %v551_v12 }
 0x17e   :  { %2716 = vmatprep.subr.bf16.mxu0 %v3988_v36  ;;  %v4063_v36 = vld [vmem:[#allocation8 + $0x40] sm:$0xff]  }
 0x17f   :  { %v611_v35 = vpack.c.bf16 %v554_v34, %v375_v32 }
 0x180   :  { %2545 = vmatpush1.bf16.msra.mxu1 %v3983_v15  ;;  %v4070_v15 = vld [vmem:[#allocation8 + $0x18] sm:$0xff]  }
 0x181   :  { %2717 = vmatpush1.bf16.msra.mxu0 %v3986_v16  ;;  %3454 = vmatprep.subr.bf16.mxu1 %v4063_v36  ;;  %v4071_v16 = vld [vmem:[#allocation8 + $0x60] sm:$0xff]  }
 0x182   :  { %2729 = vmatprep.subr.bf16.mxu0 %v3999_v50  ;;  %v4074_v50 = vld [vmem:[#allocation8 + $0x28] sm:$0xff]   ;;  %v3445_v36 = vld [vmem:[#allocation13] ss:$0 sm:$0xff] }
 0x183   :  { %2547 = vmatmul.mubr.bf16.vlgmr.msra.gmra.mrb[0].mxu1 %v599_v51  ;;  %v4075_v51 = vld [vmem:[#allocation8 + $0x70] sm:$0xff]  }
 0x184   :  { %2719 = vmatmul.mubr.bf16.vlgmr.msra.gmra.mrb[0].mxu0 %v607_v57  ;;  %3455 = vmatpush3.bf16.msra.mxu1 %v4064_v38  ;;  %v4076_v57 = vld [vmem:[#allocation8 + $0x30] sm:$0xff]  }
 0x185   :  { %2730 = vmatpush1.bf16.msra.mxu0 %v3997_v58  ;;  %2761 = vmatprep.mubr.bf16.mxu0 %v610_v59  ;;  %v4077_v58 = vld [vmem:[#allocation8 + $0x78] sm:$0xff]  }
 0x186   :  { %2731 = vmatprep.subr.bf16.mxu0 %v4002_v62  ;;  %3456 = vmatprep.subr.bf16.mxu1 %v4065_v39  ;;  %v4078_v59 = vld [vmem:[#allocation8 + $0x38] sm:$0xff]   ;;  %v4288_v62 = vmov 0.0  }
 0x188   :  { %3457 = vmatpush3.bf16.msra.mxu1 %v4066_v40 }
 0x189   :  { %2732 = vmatpush1.bf16.msra.mxu0 %v4000_v0  ;;  %3458 = vmatprep.subr.bf16.mxu1 %v4067_v54 }
 0x18a   :  { %2733 = vmatprep.subr.bf16.mxu0 %v4005_v1 }
 0x18d   :  { %2734 = vmatpush1.bf16.msra.mxu0 %v4003_v19 }
 0x18e   :  { %2735 = vmatprep.subr.bf16.mxu0 %v4008_v20 }
 0x191   :  { %2736 = vmatpush1.bf16.msra.mxu0 %v4006_v21  ;;  %v908_v21 = vsub.s32 0, %v4425_v48 }
 0x192   :  { %2737 = vmatprep.subr.bf16.mxu0 %v4011_v22  ;;  %v904_v22 = vld [vmem:[#allocation7] sm:$0x3] }
 0x195   :  { %2738 = vmatpush1.bf16.msra.mxu0 %v4009_v23  ;;  %v912_v23 = vsub.s32 1, %v4425_v48 }
 0x196   :  { %2739 = vmatprep.subr.bf16.mxu0 %v4014_v24  ;;  %v909_v24 = vrot.slane %v904_v22, %v908_v21 }
 0x199   :  { %2740 = vmatpush1.bf16.msra.mxu0 %v4012_v25  ;;  %v913_v25 = vrot.slane %v904_v22, %v912_v23 }
 0x19a   :  { %2741 = vmatprep.subr.bf16.mxu0 %v4017_v26 }
 0x19d   :  { %2742 = vmatpush1.bf16.msra.mxu0 %v4015_v27 }
 0x19e   :  { %2743 = vmatprep.subr.bf16.mxu0 %v4020_v37 }
 0x1a1   :  { %2744 = vmatpush1.bf16.msra.mxu0 %v4018_v41 }
 0x1a2   :  { %2745 = vmatprep.subr.bf16.mxu0 %v4023_v42 }
 0x1a5   :  { %2746 = vmatpush1.bf16.msra.mxu0 %v4021_v43 }
 0x1a6   :  { %2747 = vmatprep.subr.bf16.mxu0 %v4026_v44 }
 0x1a9   :  { %2748 = vmatpush1.bf16.msra.mxu0 %v4024_v45 }
 0x1aa   :  { %2749 = vmatprep.subr.bf16.mxu0 %v4029_v46 }
 0x1ad   :  { %2750 = vmatpush1.bf16.msra.mxu0 %v4027_v47 }
 0x1ae   :  { %2751 = vmatprep.subr.bf16.mxu0 %v4032_v29 }
 0x1b1   :  { %2752 = vmatpush1.bf16.msra.mxu0 %v4030_v30 }
 0x1b2   :  { %2753 = vmatprep.subr.bf16.mxu0 %v4035_v49 }
 0x1b5   :  { %2754 = vmatpush1.bf16.msra.mxu0 %v4033_v31 }
 0x1b6   :  { %2755 = vmatprep.subr.bf16.mxu0 %v4038_v52 }
 0x1b9   :  { %2756 = vmatpush1.bf16.msra.mxu0 %v4036_v53 }
 0x1ba   :  { %2757 = vmatprep.subr.bf16.mxu0 %v4041_v55 }
 0x1bd   :  { %2758 = vmatpush1.bf16.msra.mxu0 %v4039_v56  ;;  %v4079_v56 = vld [vmem:[#allocation11] sm:$0xff]  }
 0x1be   :  { %2759 = vmatprep.subr.bf16.mxu0 %v4044_v60  ;;  %v4080_v60 = vld [vmem:[#allocation11 + $0x8] sm:$0xff]  }
 0x1c1   :  { %2760 = vmatpush1.bf16.msra.mxu0 %v4042_v61  ;;  %v4081_v61 = vld [vmem:[#allocation11 + $0x10] sm:$0xff]  }
 0x1c2   :  { %2772 = vmatprep.subr.bf16.mxu0 %v4059_v63  ;;  %v4082_v63 = vld [vmem:[#allocation11 + $0x18] sm:$0xff]  }
 0x1c4   :  { %2762 = vmatmul.mubr.bf16.vlgmr.msra.gmra.mrb[0].mxu0 %v4582_v33  ;;  %v4068_v33 = vld [vmem:[#allocation8 + $0x10] sm:$0xff]  }
 0x1c5   :  { %2773 = vmatpush1.bf16.msra.mxu0 %v4057_v6  ;;  %2804 = vmatprep.mubr.bf16.mxu0 %v4287_v13 }
 0x1c6   :  { %3426 = vmatprep.subr.msk.bf16.mxu0 %vm2378_vm0, %v4060_v7  ;;  %3459 = vmatpush3.bf16.msra.mxu1 %v4068_v33  ;;  %v3428_v7 = vld [vmem:[#allocation10] ss:$0 sm:$0xff] }
 0x1c7   :  { %3460 = vmatprep.subr.bf16.mxu1 %v4069_v14 }
 0x1c9   :  { %2775 = vmatpush1.bf16.msra.mxu0 %v2380_v28 }
 0x1ca   :  { %3461 = vmatpush3.bf16.msra.mxu1 %v4070_v15 }
 0x1cb   :  { %3462 = vmatprep.subr.bf16.mxu1 %v4071_v16 }
 0x1ce   :  { %3463 = vmatpush3.bf16.msra.mxu1 %v4072_v17 }
 0x1cf   :  { %3464 = vmatprep.subr.bf16.mxu1 %v4073_v18 }
 0x1d0   :  { %3427 = vmatmul.mubr.msk.bf16.vlgmr.msra.gmra.mrb[0].mxu0 %vm2374_vm1, %v611_v35 }
 0x1d2   :  { %3465 = vmatpush3.bf16.msra.mxu1 %v4074_v50 }
 0x1d3   :  { %3466 = vmatprep.subr.bf16.mxu1 %v4075_v51 }
 0x1d6   :  { %3467 = vmatpush3.bf16.msra.mxu1 %v4076_v57 }
 0x1d7   :  { %3468 = vmatprep.subr.bf16.mxu1 %v4077_v58 }
 0x1da   :  { %3469 = vmatpush3.bf16.msra.mxu1 %v4078_v59 }
 0x1db   :  { %3485 = vmatprep.subr.bf16.mxu1 %v4288_v62 }
 0x256   :  { %v2548_v0 = vpop.f32.mrb[0].mxu1 }
 0x257   :  { %v2550_v1 = vpop.f32.mrb[1].mxu1  ;;  %v3505_v26 = vadd.f32 %v2548_v0, %v909_v24 }
 0x258   :  { %v2552_v19 = vpop.f32.mrb[2].mxu1  ;;  %v3507_v27 = vadd.f32 %v2550_v1, %v913_v25 }
 0x259   :  { %v2554_v20 = vpop.f32.mrb[3].mxu1  ;;  %v3509_v41 = vadd.f32 %v2552_v19, %v909_v24 }
 0x25a   :  { %v3511_v44 = vadd.f32 %v2554_v20, %v913_v25 }
 0x2a3   :  { %v2806_v37 = vpop.f32.mrb[0].mxu0 }
 0x2a4   :  { %v3506_v42 = vadd.f32 %v3505_v26, %v2806_v37  ;;  %v2808_v43 = vpop.f32.mrb[1].mxu0 }
 0x2a5   :  { %v3508_v45 = vadd.f32 %v3507_v27, %v2808_v43  ;;  %v2810_v46 = vpop.f32.mrb[2].mxu0 }
 0x2a6   :  { %v3510_v47 = vadd.f32 %v3509_v41, %v2810_v46  ;;  %v2812_v29 = vpop.f32.mrb[3].mxu0  ;;  %v2815_v49 = vmax.f32 %v3506_v42, 0.0 }
 0x2a7   :  { %v3512_v30 = vadd.f32 %v3511_v44, %v2812_v29  ;;  %v2816_v52 = vmax.f32 %v3508_v45, 0.0 }
 0x2a8   :  { %v2817_v31 = vmax.f32 %v3510_v47, 0.0 }
 0x2a9   :  { %v2818_v53 = vmax.f32 %v3512_v30, 0.0 }
 0x2aa   :  { %v2819_v55 = vpack.c.bf16 %v2817_v31, %v2815_v49 }
 0x2ab   :  { %v2820_v48 = vpack.c.bf16 %v2818_v53, %v2816_v52 }
 0x2ad   :  { %2988 = vmatprep.mubr.bf16.mxu1 %v2820_v48 }
 0x2ae   :  { %2989 = vmatmul.mubr.bf16.vlgmr.msra.gmra.mrb[4].mxu1 %v2819_v55 }
 0x2af   :  { %3486 = vmatpush3.bf16.msra.mxu1 %v4079_v56  ;;  %3501 = vmatprep.mubr.msk.bf16.mxu1 %vm4289_vm2, %v4288_v62 }
 0x2b0   :  { %3487 = vmatprep.subr.bf16.mxu1 %v4288_v62 }
 0x2b3   :  { %3488 = vmatpush3.bf16.msra.mxu1 %v4080_v60 }
 0x2b4   :  { %3489 = vmatprep.subr.bf16.mxu1 %v4288_v62 }
 0x2b7   :  { %3490 = vmatpush3.bf16.msra.mxu1 %v4081_v61 }
 0x2b8   :  { %3491 = vmatprep.subr.bf16.mxu1 %v4288_v62 }
 0x2bb   :  { %3492 = vmatpush3.bf16.msra.mxu1 %v4082_v63 }
 0x2bc   :  { %3493 = vmatprep.subr.bf16.mxu1 %v4288_v62 }
 0x2bf   :  { %3494 = vmatpush3.bf16.msra.mxu1 %v4083_v2 }
 0x2c0   :  { %3495 = vmatprep.subr.bf16.mxu1 %v4288_v62 }
 0x2c3   :  { %3496 = vmatpush3.bf16.msra.mxu1 %v4084_v3 }
 0x2c4   :  { %3497 = vmatprep.subr.bf16.mxu1 %v4288_v62 }
 0x2c7   :  { %3498 = vmatpush3.bf16.msra.mxu1 %v4085_v4 }
 0x2c8   :  { %3499 = vmatprep.subr.bf16.mxu1 %v4288_v62 }
 0x2cb   :  { %3500 = vmatpush3.bf16.msra.mxu1 %v4086_v5 }
 0x381   :  { %v3470_v6 = vpop.f32.mrb[4].mxu1 }
 0x382   :  { %v3471_v8 = vpop.f32.mrb[5].mxu1 }
 0x383   :  { %v3472_v9 = vadd.f32 %v3471_v8, %v3470_v6  ;;  %v3473_v10 = vpop.f32.mrb[6].mxu1 }
 0x384   :  { %v3474_v11 = vpop.f32.mrb[7].mxu1 }
 0x385   :  { %v2991_v12 = vadd.f32 %v3472_v9, %v3428_v7  ;;  %v3475_v13 = vadd.f32 %v3474_v11, %v3473_v10 }
 0x387   :  { %v2994_v28 = vadd.f32 %v3475_v13, %v3428_v7  ;;  %v2997_v32 = vmax.f32 %v2991_v12, 0.0 }
 0x389   :  { %v2998_v34 = vmax.f32 %v2994_v28, 0.0 }
 0x38b   :  { %v2999_v35 = vpack.c.bf16 %v2998_v34, %v2997_v32 }
 0x38d   :  { %3502 = vmatmul.mubr.bf16.vlgmr.msra.gmra.mrb[8].mxu1 %v2999_v35 }
 0x460   :  { %v3105_v38 = vpop.f32.mrb[8].mxu1 }
 0x461   :  { %v3106_v39 = vadd.f32 %v3445_v36, %v3105_v38  ;;  %v3503_v40 = vpop.f32.mrb[9].mxu1 }
 0x462   :  { %v3108_v54 = vpop.f32.mrb[10].mxu1 }
 0x463   :  { %3112 = vst [vmem:[#allocation14] sm:$0xff] %v3106_v39  ;;  %v3109_v33 = vadd.f32 %v3445_v36, %v3108_v54  ;;  %v3504_v14 = vpop.f32.mrb[11].mxu1 }
 0x465   :  { %3113 = vst [vmem:[#allocation14 + $0x8] sm:$0xff] %v3109_v33 }
 0x466   :  { %3118 = vsyncadd [#allocation4], 224  ;;  %s4290_s6 = smov [#allocation14]  }
 0x467   :  { %s3119_s3 = sshll.u32 %s4290_s6, 4  ;;  %s3120_s3 = int_to_ptr.vmem [resolvable:$true] %s3119_s3 }
 0x468   :  { %s4241_s16 = scalar_lea.vmem %s3120_s3, 32  ;;  %s4245_s0 = scalar_lea.vmem %s3120_s3, 256 }
 0x469   :  { %p4242_p0 = scmp.ne.s32.totalorder %s3120_s3, %s4241_s16  ;;  %p4246_p1 = scmp.lt.s32.totalorder %s3120_s3, %s3120_s3 }
 0x46a   :  { %p4247_p2 = scmp.lt.s32.totalorder %s4245_s0, %s4241_s16 }
 0x46c   :  { %p4248_p3 = por %p4247_p2, %p4246_p1 }
 0x46e   :  { %p4249_p4 = pnand %p4248_p3, %p4242_p0 }
 0x470   :  { %4252 = shalt.err (!%p4249_p4)
}
 0x471   :  { %s4253_s18 = scalar_lea.hbm %s4622_s7, 32 }
 0x472   :  { %p4254_p5 = scmp.ne.s32.totalorder %s4622_s7, %s4253_s18  ;;  %p4257_p6 = scmp.lt.u32.totalorder %s4253_s18, %s4622_s7 }
 0x474   :  { %p4259_p7 = pnand %p4257_p6, %p4254_p5 }
 0x476   :  { %4262 = shalt.err (!%p4259_p7)
}
 0x477   :  { %s4291_s23 = smov 32   ;;  %s4292_s24 = smov 2  }
 0x478   :  { %3125 = dma.vmem_to_hbm [thread:$0]  %s3120_s3, 32, %s4622_s7, [#allocation4], %s4291_s23, %s4291_s23, %s4292_s24  }
 0x479   :  { %4271 = dma.done.wait [#allocation4], 256  }
 0x47a   :  { %4272 = vsyncadd [#allocation4], 4294967040 }
 0x47b   :  { %3129 = vsyncpa [#allocation3], 1 }
 0x47c   :  { %3130 = vsyncpa [#allocation6], 1 }
 0x47d   :  { %3131 = vsyncpa [#allocation9], 1 }
 0x47e   :  { %3132 = vsyncpa [#allocation12], 1 }
 0x47f   :  { %3133 = vsyncpa [#allocation4], 1 }

</bundles_post_ra>
